<compile_context>
chip_gen: v6e
topology: v6e:2x2x1
jax: 0.10.0
libtpu: 0.0.40
codegen_flags: <defaults>
</compile_context>

<pallas_src>
import functools

import jax
import jax.numpy as jnp
from jax import lax
from jax.experimental import pallas as pl
from jax.experimental.pallas import tpu as pltpu

D_MODEL = 32
NUM_HEADS = 4
HEAD_DIM = D_MODEL // NUM_HEADS
FFN_SIZE = 64
CONV_KERNEL = 15
PAD = (CONV_KERNEL - 1) // 2
FACTOR = 0.5
LN_EPS = 1e-6          # module default eps (passed to every LayerNorm)
BN_EPS = 1e-5

# ---- packed-parameter slab layout (wrapper-side packing, static kernel slices) --
# W_D slab: every matmul weight with D input rows, each chunk padded to 128 lanes.
OFF_F1W1 = 0 * 128     # (D, FFN_SIZE)
OFF_WQKV = 1 * 128     # (D, 3*D)  fused Q|K|V
OFF_WO = 2 * 128       # (D, D)
OFF_PW1 = 3 * 128      # (D, 2*D)  fused GLU pointwise
OFF_PW2 = 4 * 128      # (D, D)
OFF_F2W1 = 5 * 128     # (D, FFN_SIZE)
WD_COLS = 6 * 128
# W_F slab: FFN down-projections (FFN_SIZE input rows).
OFF_F1W2 = 0 * 128     # (FFN_SIZE, D)
OFF_F2W2 = 1 * 128     # (FFN_SIZE, D)
WF_COLS = 2 * 128
# VEC slab: one row per bias / LN vector / folded depthwise tap, padded to 128 lanes.
ROW_F1B1, ROW_F1B2, ROW_F1G, ROW_F1B = 0, 1, 2, 3
ROW_BQKV, ROW_BO, ROW_AG, ROW_AB = 4, 5, 6, 7
ROW_PW1B, ROW_DWB, ROW_PW2B, ROW_CG, ROW_CB = 8, 9, 10, 11, 12
ROW_F2B1, ROW_F2B2, ROW_F2G, ROW_F2B = 13, 14, 15, 16
ROW_DW0 = 17                              # 15 folded depthwise-conv tap rows
VEC_ROWS = ROW_DW0 + CONV_KERNEL          # 32


# ------------------------------------------------------------ kernel helpers -
def _sigmoid(x):
    # Numerically stable (no exp overflow), tanh rides the EUP slot.
    return 0.5 * (jnp.tanh(0.5 * x) + 1.0)


def _swish(x):
    return x * _sigmoid(x)


def _layer_norm(x, gamma, beta, eps=LN_EPS):
    mu = jnp.mean(x, axis=-1, keepdims=True)
    var = jnp.mean((x - mu) ** 2, axis=-1, keepdims=True)
    return (x - mu) * lax.rsqrt(var + eps) * gamma + beta


def _round_up(n, m):
    return ((n + m - 1) // m) * m


# --------------------------------------------------------- fused layer kernel -
def _make_kernel(Bb, T, tpad, compute_dtype, return_attn):
    """One grid step == `Bb` sequences; the (Bb*T, D) activation stays resident
    in VMEM/vregs across the whole conformer layer."""
    D, H, hd, F, K = D_MODEL, NUM_HEADS, HEAD_DIM, FFN_SIZE, CONV_KERNEL
    pad_hi = tpad - (PAD + T)

    def kernel(*refs):
        if return_attn:
            x_ref, wd_ref, wf_ref, vec_ref, out_ref, sax_ref, attn_ref, conv_buf = refs
        else:
            x_ref, wd_ref, wf_ref, vec_ref, out_ref, sax_ref, conv_buf = refs
            attn_ref = None

        def vrow(i, w):
            return vec_ref[i:i + 1, :w]                    # (1, w) bias/LN/tap row

        def dotw(a, w_ref, off, width, brow):
            w = w_ref[:, off:off + width]                  # static, 128-aligned slice
            return (jnp.dot(a.astype(compute_dtype), w,
                            preferred_element_type=jnp.float32)
                    + vrow(brow, width))

        def ffn(v, w1off, b1row, w2off, b2row, grow, brow):
            hid = _swish(dotw(v, wd_ref, w1off, F, b1row))
            hid = dotw(hid, wf_ref, w2off, D, b2row)
            return _layer_norm(v + FACTOR * hid, vrow(grow, D), vrow(brow, D))

        # ---- load activation block, flatten (Bb, T, D) -> (Bb*T, D) -----------
        if Bb == 1:
            x = x_ref[0].astype(jnp.float32)
        else:
            x = jnp.concatenate([x_ref[bi] for bi in range(Bb)],
                                axis=0).astype(jnp.float32)

        # ---------------- ffn_1 (post-norm, half-step residual) ----------------
        x = ffn(x, OFF_F1W1, ROW_F1B1, OFF_F1W2, ROW_F1B2, ROW_F1G, ROW_F1B)

        # ---------------- multi-head self-attention ----------------------------
        qkv = dotw(x, wd_ref, OFF_WQKV, 3 * D, ROW_BQKV)   # (Bb*T, 3D) fused QKV
        gq, gk, gv = [], [], []
        for bi in range(Bb):
            rows = qkv[bi * T:(bi + 1) * T]                # (T, 3D) sublane slice
            for h in range(H):
                gq.append(rows[:, h * hd:(h + 1) * hd])
                gk.append(rows[:, D + h * hd:D + (h + 1) * hd])
                gv.append(rows[:, 2 * D + h * hd:2 * D + (h + 1) * hd])
        qh = jnp.stack(gq, axis=0)                         # (Bb*H, T, hd)
        kh = jnp.stack(gk, axis=0)
        vh = jnp.stack(gv, axis=0)

        scale = 1.0 / (hd ** 0.5)
        s = jnp.einsum('gtd,gsd->gts', qh.astype(compute_dtype),
                       kh.astype(compute_dtype),
                       preferred_element_type=jnp.float32) * scale
        m = jnp.max(s, axis=-1, keepdims=True)
        e = jnp.exp(s - m)
        p = e / jnp.sum(e, axis=-1, keepdims=True)         # exact probs (user-visible)
        if return_attn:
            for bi in range(Bb):
                attn_ref[bi] = p[bi * H:(bi + 1) * H].astype(attn_ref.dtype)
        o = jnp.einsum('gts,gsd->gtd', p.astype(compute_dtype),
                       vh.astype(compute_dtype),
                       preferred_element_type=jnp.float32)  # (Bb*H, T, hd)
        orows = [jnp.concatenate([o[bi * H + h] for h in range(H)], axis=1)
                 for bi in range(Bb)]
        oc = orows[0] if Bb == 1 else jnp.concatenate(orows, axis=0)   # (Bb*T, D)
        oc = dotw(oc, wd_ref, OFF_WO, D, ROW_BO)           # single output projection
        x = _layer_norm(x + oc, vrow(ROW_AG, D), vrow(ROW_AB, D))
        for bi in range(Bb):
            sax_ref[bi] = x[bi * T:(bi + 1) * T].astype(sax_ref.dtype)

        # ---------------- convolution module -----------------------------------
        # Fused (D, 2D) GLU pointwise matmul + single lane split.
        y = dotw(x, wd_ref, OFF_PW1, 2 * D, ROW_PW1B)      # (Bb*T, 2D)
        y = y[:, :D] * _sigmoid(y[:, D:2 * D])             # GLU
        # Depthwise conv via VMEM scratch (zeroed pad rows) + ref-based shifted
        # loads; BatchNorm (eval) already folded into the tap weights / bias.
        for bi in range(Bb):
            conv_buf[bi, :PAD, :] = jnp.zeros((PAD, D), jnp.float32)
            conv_buf[bi, PAD + T:tpad, :] = jnp.zeros((pad_hi, D), jnp.float32)
            conv_buf[bi, PAD:PAD + T, :] = y[bi * T:(bi + 1) * T, :]
        acc_rows = []
        for bi in range(Bb):
            parts = [jnp.zeros((T, D), jnp.float32) for _ in range(4)]
            for kk in range(K):
                tap = conv_buf[bi, kk:kk + T, :]           # shifted ref load
                parts[kk % 4] = parts[kk % 4] + tap * vrow(ROW_DW0 + kk, D)
            acc_rows.append((parts[0] + parts[1]) + (parts[2] + parts[3]))
        acc = acc_rows[0] if Bb == 1 else jnp.concatenate(acc_rows, axis=0)
        acc = _swish(acc + vrow(ROW_DWB, D))
        z = dotw(acc, wd_ref, OFF_PW2, D, ROW_PW2B)
        x = _layer_norm(x + z, vrow(ROW_CG, D), vrow(ROW_CB, D))

        # ---------------- ffn_2 -------------------------------------------------
        x = ffn(x, OFF_F2W1, ROW_F2B1, OFF_F2W2, ROW_F2B2, ROW_F2G, ROW_F2B)
        for bi in range(Bb):
            out_ref[bi] = x[bi * T:(bi + 1) * T].astype(out_ref.dtype)

    return kernel


# --------------------------------------------------- wrapper-side param prep --
def _prepare_inputs(params, use_bf16):
    mm_dt = jnp.bfloat16 if use_bf16 else jnp.float32
    f1, a, c, f2 = params['ffn_1'], params['attn'], params['conv'], params['ffn_2']

    # fuse Q/K/V projections into a single (D, 3D) weight
    wqkv = jnp.concatenate([a['wq'], a['wk'], a['wv']], axis=1)
    bqkv = jnp.concatenate([a['bq'], a['bk'], a['bv']], axis=1)

    # fold eval-mode BatchNorm1d into the depthwise conv weight / bias
    bn_s = c['bn_g'] * lax.rsqrt(c['bn_var'] + BN_EPS)          # (1, D)
    dw_w = c['dw_w'] * bn_s                                     # (K, D)
    dw_b = (c['dw_b'] - c['bn_mean']) * bn_s + c['bn_b']        # (1, D)

    def pad128(w):
        return jnp.pad(w, ((0, 0), (0, 128 - w.shape[-1])))

    # matmul-weight slabs (lane-dense, 128-aligned chunks)
    wd = jnp.concatenate(
        [pad128(f1['w1']), pad128(wqkv), pad128(a['wo']),
         pad128(c['pw1_w']), pad128(c['pw2_w']), pad128(f2['w1'])],
        axis=1).astype(mm_dt)                                   # (D, 768)
    wf = jnp.concatenate([pad128(f1['w2']), pad128(f2['w2'])],
                         axis=1).astype(mm_dt)                  # (F, 256)

    # one slab for every bias / LN vector / folded depthwise tap (f32)
    vec_rows = [f1['b1'], f1['b2'], f1['ln_g'], f1['ln_b'],
                bqkv, a['bo'], a['ln_g'], a['ln_b'],
                c['pw1_b'], dw_b, c['pw2_b'], c['ln_g'], c['ln_b'],
                f2['b1'], f2['b2'], f2['ln_g'], f2['ln_b']]
    vec_rows += [dw_w[k:k + 1] for k in range(CONV_KERNEL)]
    vec = jnp.concatenate([pad128(r.astype(jnp.float32)) for r in vec_rows],
                          axis=0)                               # (32, 128)
    assert vec.shape == (VEC_ROWS, 128)
    return wd, wf, vec


def _pick_batch_block(B, T):
    """Largest batch block that keeps grid >= 2 (v7x megacore), stays sublane
    aligned (T % 8 == 0 when Bb > 1) and keeps the per-step (Bb,H,T,T)
    attention intermediates small."""
    if B <= 1:
        return 1
    if T % 8 != 0:
        return 1
    cap = max(1, (8 * 2 ** 20) // max(1, 3 * NUM_HEADS * T * T * 4))
    best = 1
    for cand in range(1, B // 2 + 1):
        if B % cand == 0 and cand <= cap:
            best = cand
    return best


def _vmem_limit(Bb, T, tpad, weights, return_attn, attn_dtype):
    act = Bb * T * D_MODEL * 4
    attn = Bb * NUM_HEADS * T * T * (jnp.dtype(attn_dtype).itemsize
                                     if return_attn else 0)
    wbytes = sum(int(w.size) * jnp.dtype(w.dtype).itemsize for w in weights)
    scratch = Bb * tpad * D_MODEL * 4
    interm = 4 * Bb * NUM_HEADS * T * T * 4 + 8 * act
    need = 2 * (3 * act + attn + wbytes) + scratch + interm
    # raise above the 32 MiB scoped default only when needed (v6e/v5e have
    # 128 MiB physical); keep a ceiling well under v7x's 64 MiB.
    return int(min(48 * 2 ** 20, max(32 * 2 ** 20, 2 * need)))


def _cost_numbers(B, T, weights, return_attn, attn_dtype):
    D, F, H, K = D_MODEL, FFN_SIZE, NUM_HEADS, CONV_KERNEL
    flops = B * T * (8 * D * F                                  # two FFNs
                     + 6 * D * D + 4 * T * D + 2 * D * D        # attention
                     + 4 * D * D + 2 * K * D + 2 * D * D)       # conv module
    transcendentals = B * T * (2 * F + H * T + 2 * D)
    param_bytes = sum(int(w.size) * jnp.dtype(w.dtype).itemsize for w in weights)
    attn_bytes = (B * H * T * T * jnp.dtype(attn_dtype).itemsize
                  if return_attn else 0)
    bytes_accessed = 4 * B * T * D * 3 + attn_bytes + param_bytes
    return int(flops), int(transcendentals), int(bytes_accessed)


# ------------------------------------------------------------------ full layer -
def conformer_encoder_layer(x, params, mask=None, pos_emb=None, use_bf16=True,
                            return_attn=True, attn_dtype=jnp.float32,
                            batch_block=None):
    # TODO(synk): mask / pos_emb (relative positional attention variants) are not
    # implemented; only the standard MHSA path with mask=None, pos_emb=None.
    B, T, D = x.shape
    assert D == D_MODEL, "kernel is specialized to d_model=32"
    wd, wf, vec = _prepare_inputs(params, use_bf16)

    Bb = batch_block if batch_block is not None else _pick_batch_block(B, T)
    assert B % Bb == 0
    grid = (B // Bb,)
    tpad = _round_up(T + 2 * PAD, 8)

    in_specs = [
        pl.BlockSpec((Bb, T, D), lambda b: (b, 0, 0)),
        pl.BlockSpec(wd.shape, lambda b: (0, 0)),
        pl.BlockSpec(wf.shape, lambda b: (0, 0)),
        pl.BlockSpec(vec.shape, lambda b: (0, 0)),
    ]
    out_specs = [pl.BlockSpec((Bb, T, D), lambda b: (b, 0, 0)),
                 pl.BlockSpec((Bb, T, D), lambda b: (b, 0, 0))]
    out_shape = [jax.ShapeDtypeStruct((B, T, D), x.dtype),
                 jax.ShapeDtypeStruct((B, T, D), x.dtype)]
    if return_attn:
        out_specs.append(pl.BlockSpec((Bb, NUM_HEADS, T, T),
                                      lambda b: (b, 0, 0, 0)))
        out_shape.append(jax.ShapeDtypeStruct((B, NUM_HEADS, T, T), attn_dtype))

    weights = (wd, wf, vec)
    flops, transc, bytes_acc = _cost_numbers(B, T, weights, return_attn, attn_dtype)
    vmem_limit = _vmem_limit(Bb, T, tpad, weights, return_attn, attn_dtype)

    results = pl.pallas_call(
        _make_kernel(Bb, T, tpad, jnp.bfloat16 if use_bf16 else jnp.float32,
                     return_attn),
        grid=grid,
        in_specs=in_specs,
        out_specs=tuple(out_specs),
        out_shape=tuple(out_shape),
        scratch_shapes=[pltpu.VMEM((Bb, tpad, D), jnp.float32)],
        compiler_params=pltpu.CompilerParams(
            dimension_semantics=("parallel",),      # both TensorCores on v7x
            vmem_limit_bytes=vmem_limit),
        cost_estimate=pl.CostEstimate(flops=flops, transcendentals=transc,
                                      bytes_accessed=bytes_acc),
    )(x, wd, wf, vec)

    if return_attn:
        out, sa_x, attn = results
    else:
        (out, sa_x), attn = results, None
    return out, {'x': sa_x, 'attn': attn}


# -------------------------------------------------------- pure-JAX reference --
def reference_layer(x, params):
    def ln(v, g, b):
        mu = jnp.mean(v, axis=-1, keepdims=True)
        var = jnp.mean((v - mu) ** 2, axis=-1, keepdims=True)
        return (v - mu) * lax.rsqrt(var + LN_EPS) * g + b

    def swish(v):
        return v * jax.nn.sigmoid(v)

    def ffn(v, p):
        h = swish(v @ p['w1'] + p['b1'])
        h = h @ p['w2'] + p['b2']
        return ln(v + FACTOR * h, p['ln_g'], p['ln_b'])

    B, T, D = x.shape
    x = ffn(x, params['ffn_1'])

    a = params['attn']
    q = x @ a['wq'] + a['bq']
    k = x @ a['wk'] + a['bk']
    v = x @ a['wv'] + a['bv']
    qh = q.reshape(B, T, NUM_HEADS, HEAD_DIM).transpose(0, 2, 1, 3)
    kh = k.reshape(B, T, NUM_HEADS, HEAD_DIM).transpose(0, 2, 1, 3)
    vh = v.reshape(B, T, NUM_HEADS, HEAD_DIM).transpose(0, 2, 1, 3)
    s = jnp.einsum('bhtd,bhsd->bhts', qh, kh) / (HEAD_DIM ** 0.5)
    p = jax.nn.softmax(s, axis=-1)
    o = jnp.einsum('bhts,bhsd->bhtd', p, vh)
    o = o.transpose(0, 2, 1, 3).reshape(B, T, D)
    o = o @ a['wo'] + a['bo']
    x = ln(x + o, a['ln_g'], a['ln_b'])
    sa = {'x': x, 'attn': p}

    c = params['conv']
    y = x @ c['pw1_w'] + c['pw1_b']
    y = y[..., :D] * jax.nn.sigmoid(y[..., D:])
    ypad = jnp.pad(y, ((0, 0), (PAD, PAD), (0, 0)))
    acc = sum(ypad[:, kk:kk + T, :] * c['dw_w'][kk] for kk in range(CONV_KERNEL))
    acc = acc + c['dw_b']
    acc = (acc - c['bn_mean']) * lax.rsqrt(c['bn_var'] + BN_EPS) * c['bn_g'] + c['bn_b']
    acc = swish(acc)
    z = acc @ c['pw2_w'] + c['pw2_b']
    x = ln(x + z, c['ln_g'], c['ln_b'])

    x = ffn(x, params['ffn_2'])
    return x, sa


# ------------------------------------------------------------------ param init -
def init_params(key):
    def dense(k, din, dout, scale=0.02):
        kw, kb = jax.random.split(k)
        return (scale * jax.random.normal(kw, (din, dout), jnp.float32),
                scale * jax.random.normal(kb, (1, dout), jnp.float32))

    keys = jax.random.split(key, 12)
    ones = jnp.ones((1, D_MODEL), jnp.float32)
    zeros = jnp.zeros((1, D_MODEL), jnp.float32)

    def ffn_params(k1, k2):
        w1, b1 = dense(k1, D_MODEL, FFN_SIZE)
        w2, b2 = dense(k2, FFN_SIZE, D_MODEL)
        return dict(w1=w1, b1=b1, w2=w2, b2=b2, ln_g=ones, ln_b=zeros)

    wq, bq = dense(keys[2], D_MODEL, D_MODEL)
    wk, bk = dense(keys[3], D_MODEL, D_MODEL)
    wv, bv = dense(keys[4], D_MODEL, D_MODEL)
    wo, bo = dense(keys[5], D_MODEL, D_MODEL)
    attn = dict(wq=wq, bq=bq, wk=wk, bk=bk, wv=wv, bv=bv, wo=wo, bo=bo,
                ln_g=ones, ln_b=zeros)

    pw1_w, pw1_b = dense(keys[6], D_MODEL, 2 * D_MODEL)
    pw2_w, pw2_b = dense(keys[7], D_MODEL, D_MODEL)
    dw_w = 0.02 * jax.random.normal(keys[8], (CONV_KERNEL, D_MODEL), jnp.float32)
    dw_b = 0.02 * jax.random.normal(keys[9], (1, D_MODEL), jnp.float32)
    conv = dict(pw1_w=pw1_w, pw1_b=pw1_b, dw_w=dw_w, dw_b=dw_b,
                bn_g=ones, bn_b=zeros, bn_mean=zeros, bn_var=ones,
                pw2_w=pw2_w, pw2_b=pw2_b, ln_g=ones, ln_b=zeros)

    return dict(ffn_1=ffn_params(keys[0], keys[1]),
                attn=attn,
                conv=conv,
                ffn_2=ffn_params(keys[10], keys[11]))


if __name__ == "__main__":
    key = jax.random.PRNGKey(0)
    kx, kp = jax.random.split(key)
    B, T = 2, 8
    x = jax.random.normal(kx, (B, T, D_MODEL), jnp.float32)
    params = init_params(kp)

    ref_out, ref_sa = reference_layer(x, params)

    fwd_f32 = jax.jit(functools.partial(conformer_encoder_layer, use_bf16=False))
    fwd_bf16 = jax.jit(functools.partial(conformer_encoder_layer, use_bf16=True))
    fwd_noattn = jax.jit(functools.partial(conformer_encoder_layer,
                                           use_bf16=True, return_attn=False))

    out32, sa32 = fwd_f32(x, params)
    jax.block_until_ready((out32, sa32))
    out16, sa16 = fwd_bf16(x, params)
    jax.block_until_ready((out16, sa16))
    outna, sana = fwd_noattn(x, params)
    jax.block_until_ready((outna, sana))

    assert out32.shape == (B, T, D_MODEL)
    assert sa32['x'].shape == (B, T, D_MODEL)
    assert sa32['attn'].shape == (B, NUM_HEADS, T, T)
    assert sana['attn'] is None
    assert bool(jnp.all(jnp.isfinite(out32)))
    assert bool(jnp.all(jnp.isfinite(out16)))
    assert bool(jnp.all(jnp.isfinite(outna)))

    # f32-matmul kernel vs pure-JAX reference (exact softmax / stable sigmoid)
    assert bool(jnp.allclose(out32, ref_out, atol=1e-2, rtol=1e-2))
    assert bool(jnp.allclose(sa32['x'], ref_sa['x'], atol=1e-2, rtol=1e-2))
    assert bool(jnp.allclose(sa32['attn'], ref_sa['attn'], atol=1e-2, rtol=1e-2))
    # bf16-matmul (performance config) vs reference, looser tolerance
    assert bool(jnp.allclose(out16, ref_out, atol=6e-2, rtol=6e-2))
    assert bool(jnp.allclose(sa16['x'], ref_sa['x'], atol=6e-2, rtol=6e-2))
    # attention-output-disabled path computes the same activations
    assert bool(jnp.allclose(outna, out16, atol=1e-4, rtol=1e-4))
    assert bool(jnp.allclose(sana['x'], sa16['x'], atol=1e-4, rtol=1e-4))

    print("KERNEL_OK")
</pallas_src>

<mosaic_0001>
module attributes {stable_mosaic.version = 11 : i64} {
  func.func @kernel(%arg0: i32, %arg1: memref<1x8x32xf32, #tpu.memory_space<vmem>>, %arg2: memref<32x768xf32, #tpu.memory_space<vmem>>, %arg3: memref<64x256xf32, #tpu.memory_space<vmem>>, %arg4: memref<32x128xf32, #tpu.memory_space<vmem>>, %arg5: memref<1x8x32xf32, #tpu.memory_space<vmem>>, %arg6: memref<1x8x32xf32, #tpu.memory_space<vmem>>, %arg7: memref<1x4x8x8xf32, #tpu.memory_space<vmem>>, %arg8: memref<1x24x32xf32, #tpu.memory_space<vmem>>) attributes {dimension_semantics = [#tpu.dimension_semantics<parallel>], iteration_bounds = array<i64: 2>, scalar_prefetch = 0 : i64, scratch_operands = 1 : i64, tpu.core_type = #tpu.core_type<tc>, window_params = [{transform_indices = @transform_0, window_bounds = array<i64: 1, 8, 32>}, {pipeline_mode = #tpu.pipeline_mode<synchronous>, transform_indices = @transform_1, window_bounds = array<i64: 32, 768>}, {pipeline_mode = #tpu.pipeline_mode<synchronous>, transform_indices = @transform_2, window_bounds = array<i64: 64, 256>}, {pipeline_mode = #tpu.pipeline_mode<synchronous>, transform_indices = @transform_3, window_bounds = array<i64: 32, 128>}, {transform_indices = @transform_4, window_bounds = array<i64: 1, 8, 32>}, {transform_indices = @transform_5, window_bounds = array<i64: 1, 8, 32>}, {transform_indices = @transform_6, window_bounds = array<i64: 1, 4, 8, 8>}]} {
    %c0 = arith.constant 0 : index
    %c0_0 = arith.constant 0 : index
    %c0_1 = arith.constant 0 : index
    %0 = vector.load %arg1[%c0, %c0_0, %c0_1] : memref<1x8x32xf32, #tpu.memory_space<vmem>>, vector<1x8x32xf32>
    %1 = vector.shape_cast %0 : vector<1x8x32xf32> to vector<8x32xf32>
    %c0_2 = arith.constant 0 : index
    %c0_3 = arith.constant 0 : index
    %2 = vector.load %arg2[%c0_2, %c0_3] : memref<32x768xf32, #tpu.memory_space<vmem>>, vector<32x64xf32>
    %cst = arith.constant dense<0.000000e+00> : vector<8x64xf32>
    %3 = tpu.matmul %1, %2, %cst {dimension_numbers = #tpu.dot_dimension_numbers<[1], [0], [0], [1], [0, 0, 1, 1], [], []>} : vector<8x32xf32>, vector<32x64xf32>, vector<8x64xf32> -> vector<8x64xf32>
    %c0_4 = arith.constant 0 : index
    %c0_5 = arith.constant 0 : index
    %4 = vector.load %arg4[%c0_4, %c0_5] : memref<32x128xf32, #tpu.memory_space<vmem>>, vector<1x64xf32>
    %5 = vector.broadcast %4 : vector<1x64xf32> to vector<8x64xf32>
    %6 = arith.addf %3, %5 : vector<8x64xf32>
    %cst_6 = arith.constant 5.000000e-01 : f32
    %7 = vector.broadcast %cst_6 : f32 to vector<8x64xf32>
    %8 = arith.mulf %7, %6 : vector<8x64xf32>
    %9 = math.tanh %8 : vector<8x64xf32>
    %cst_7 = arith.constant 1.000000e+00 : f32
    %10 = vector.broadcast %cst_7 : f32 to vector<8x64xf32>
    %11 = arith.addf %9, %10 : vector<8x64xf32>
    %cst_8 = arith.constant 5.000000e-01 : f32
    %12 = vector.broadcast %cst_8 : f32 to vector<8x64xf32>
    %13 = arith.mulf %12, %11 : vector<8x64xf32>
    %14 = arith.mulf %6, %13 : vector<8x64xf32>
    %c0_9 = arith.constant 0 : index
    %c0_10 = arith.constant 0 : index
    %15 = vector.load %arg3[%c0_9, %c0_10] : memref<64x256xf32, #tpu.memory_space<vmem>>, vector<64x32xf32>
    %cst_11 = arith.constant dense<0.000000e+00> : vector<8x32xf32>
    %16 = tpu.matmul %14, %15, %cst_11 {dimension_numbers = #tpu.dot_dimension_numbers<[1], [0], [0], [1], [0, 0, 1, 1], [], []>} : vector<8x64xf32>, vector<64x32xf32>, vector<8x32xf32> -> vector<8x32xf32>
    %c1 = arith.constant 1 : index
    %c0_12 = arith.constant 0 : index
    %17 = vector.load %arg4[%c1, %c0_12] : memref<32x128xf32, #tpu.memory_space<vmem>>, vector<1x32xf32>
    %18 = vector.broadcast %17 : vector<1x32xf32> to vector<8x32xf32>
    %19 = arith.addf %16, %18 : vector<8x32xf32>
    %cst_13 = arith.constant 5.000000e-01 : f32
    %20 = vector.broadcast %cst_13 : f32 to vector<8x32xf32>
    %21 = arith.mulf %20, %19 : vector<8x32xf32>
    %22 = arith.addf %1, %21 : vector<8x32xf32>
    %c2 = arith.constant 2 : index
    %c0_14 = arith.constant 0 : index
    %23 = vector.load %arg4[%c2, %c0_14] : memref<32x128xf32, #tpu.memory_space<vmem>>, vector<1x32xf32>
    %c3 = arith.constant 3 : index
    %c0_15 = arith.constant 0 : index
    %24 = vector.load %arg4[%c3, %c0_15] : memref<32x128xf32, #tpu.memory_space<vmem>>, vector<1x32xf32>
    %cst_16 = arith.constant dense<0.000000e+00> : vector<8xf32>
    %25 = vector.multi_reduction <add>, %22, %cst_16 [1] : vector<8x32xf32> to vector<8xf32>
    %26 = vector.shape_cast %25 : vector<8xf32> to vector<8x1xf32>
    %cst_17 = arith.constant 3.200000e+01 : f32
    %27 = vector.broadcast %cst_17 : f32 to vector<8x1xf32>
    %28 = arith.divf %26, %27 : vector<8x1xf32>
    %29 = vector.broadcast %28 : vector<8x1xf32> to vector<8x32xf32>
    %30 = arith.subf %22, %29 : vector<8x32xf32>
    %31 = arith.mulf %30, %30 : vector<8x32xf32>
    %cst_18 = arith.constant dense<0.000000e+00> : vector<8xf32>
    %32 = vector.multi_reduction <add>, %31, %cst_18 [1] : vector<8x32xf32> to vector<8xf32>
    %33 = vector.shape_cast %32 : vector<8xf32> to vector<8x1xf32>
    %cst_19 = arith.constant 3.200000e+01 : f32
    %34 = vector.broadcast %cst_19 : f32 to vector<8x1xf32>
    %35 = arith.divf %33, %34 : vector<8x1xf32>
    %36 = vector.broadcast %28 : vector<8x1xf32> to vector<8x32xf32>
    %37 = arith.subf %22, %36 : vector<8x32xf32>
    %cst_20 = arith.constant 9.99999997E-7 : f32
    %38 = vector.broadcast %cst_20 : f32 to vector<8x1xf32>
    %39 = arith.addf %35, %38 : vector<8x1xf32>
    %40 = math.rsqrt %39 : vector<8x1xf32>
    %41 = vector.broadcast %40 : vector<8x1xf32> to vector<8x32xf32>
    %42 = arith.mulf %37, %41 : vector<8x32xf32>
    %43 = vector.broadcast %23 : vector<1x32xf32> to vector<8x32xf32>
    %44 = arith.mulf %42, %43 : vector<8x32xf32>
    %45 = vector.broadcast %24 : vector<1x32xf32> to vector<8x32xf32>
    %46 = arith.addf %44, %45 : vector<8x32xf32>
    %c0_21 = arith.constant 0 : index
    %c128 = arith.constant 128 : index
    %47 = vector.load %arg2[%c0_21, %c128] : memref<32x768xf32, #tpu.memory_space<vmem>>, vector<32x96xf32>
    %cst_22 = arith.constant dense<0.000000e+00> : vector<8x96xf32>
    %48 = tpu.matmul %46, %47, %cst_22 {dimension_numbers = #tpu.dot_dimension_numbers<[1], [0], [0], [1], [0, 0, 1, 1], [], []>} : vector<8x32xf32>, vector<32x96xf32>, vector<8x96xf32> -> vector<8x96xf32>
    %c4 = arith.constant 4 : index
    %c0_23 = arith.constant 0 : index
    %49 = vector.load %arg4[%c4, %c0_23] : memref<32x128xf32, #tpu.memory_space<vmem>>, vector<1x96xf32>
    %50 = vector.broadcast %49 : vector<1x96xf32> to vector<8x96xf32>
    %51 = arith.addf %48, %50 : vector<8x96xf32>
    %52 = vector.extract_strided_slice %51 {offsets = [0, 0], sizes = [8, 8], strides = [1, 1]} : vector<8x96xf32> to vector<8x8xf32>
    %53 = vector.extract_strided_slice %51 {offsets = [0, 32], sizes = [8, 8], strides = [1, 1]} : vector<8x96xf32> to vector<8x8xf32>
    %54 = vector.extract_strided_slice %51 {offsets = [0, 64], sizes = [8, 8], strides = [1, 1]} : vector<8x96xf32> to vector<8x8xf32>
    %55 = vector.extract_strided_slice %51 {offsets = [0, 8], sizes = [8, 8], strides = [1, 1]} : vector<8x96xf32> to vector<8x8xf32>
    %56 = vector.extract_strided_slice %51 {offsets = [0, 40], sizes = [8, 8], strides = [1, 1]} : vector<8x96xf32> to vector<8x8xf32>
    %57 = vector.extract_strided_slice %51 {offsets = [0, 72], sizes = [8, 8], strides = [1, 1]} : vector<8x96xf32> to vector<8x8xf32>
    %58 = vector.extract_strided_slice %51 {offsets = [0, 16], sizes = [8, 8], strides = [1, 1]} : vector<8x96xf32> to vector<8x8xf32>
    %59 = vector.extract_strided_slice %51 {offsets = [0, 48], sizes = [8, 8], strides = [1, 1]} : vector<8x96xf32> to vector<8x8xf32>
    %60 = vector.extract_strided_slice %51 {offsets = [0, 80], sizes = [8, 8], strides = [1, 1]} : vector<8x96xf32> to vector<8x8xf32>
    %61 = vector.extract_strided_slice %51 {offsets = [0, 24], sizes = [8, 8], strides = [1, 1]} : vector<8x96xf32> to vector<8x8xf32>
    %62 = vector.extract_strided_slice %51 {offsets = [0, 56], sizes = [8, 8], strides = [1, 1]} : vector<8x96xf32> to vector<8x8xf32>
    %63 = vector.extract_strided_slice %51 {offsets = [0, 88], sizes = [8, 8], strides = [1, 1]} : vector<8x96xf32> to vector<8x8xf32>
    %64 = vector.shape_cast %52 : vector<8x8xf32> to vector<1x8x8xf32>
    %65 = vector.shape_cast %55 : vector<8x8xf32> to vector<1x8x8xf32>
    %66 = vector.shape_cast %58 : vector<8x8xf32> to vector<1x8x8xf32>
    %67 = vector.shape_cast %61 : vector<8x8xf32> to vector<1x8x8xf32>
    %68 = tpu.concatenate %64, %65, %66, %67 in 0 : vector<1x8x8xf32>, vector<1x8x8xf32>, vector<1x8x8xf32>, vector<1x8x8xf32> -> vector<4x8x8xf32>
    %69 = vector.shape_cast %53 : vector<8x8xf32> to vector<1x8x8xf32>
    %70 = vector.shape_cast %56 : vector<8x8xf32> to vector<1x8x8xf32>
    %71 = vector.shape_cast %59 : vector<8x8xf32> to vector<1x8x8xf32>
    %72 = vector.shape_cast %62 : vector<8x8xf32> to vector<1x8x8xf32>
    %73 = tpu.concatenate %69, %70, %71, %72 in 0 : vector<1x8x8xf32>, vector<1x8x8xf32>, vector<1x8x8xf32>, vector<1x8x8xf32> -> vector<4x8x8xf32>
    %74 = vector.shape_cast %54 : vector<8x8xf32> to vector<1x8x8xf32>
    %75 = vector.shape_cast %57 : vector<8x8xf32> to vector<1x8x8xf32>
    %76 = vector.shape_cast %60 : vector<8x8xf32> to vector<1x8x8xf32>
    %77 = vector.shape_cast %63 : vector<8x8xf32> to vector<1x8x8xf32>
    %78 = tpu.concatenate %74, %75, %76, %77 in 0 : vector<1x8x8xf32>, vector<1x8x8xf32>, vector<1x8x8xf32>, vector<1x8x8xf32> -> vector<4x8x8xf32>
    "tpu.trace_start"() <{level = 10 : i32, message = "gtd,gsd->gts"}> : () -> ()
    %cst_24 = arith.constant dense<0.000000e+00> : vector<4x8x8xf32>
    %79 = tpu.matmul %68, %73, %cst_24 {dimension_numbers = #tpu.dot_dimension_numbers<[2], [2], [1], [1], [0, 0, 0, 1, 1, 1], [0], [0]>} : vector<4x8x8xf32>, vector<4x8x8xf32>, vector<4x8x8xf32> -> vector<4x8x8xf32>
    "tpu.trace_stop"() : () -> ()
    %cst_25 = arith.constant 0.353553385 : f32
    %80 = vector.broadcast %cst_25 : f32 to vector<4x8x8xf32>
    %81 = arith.mulf %79, %80 : vector<4x8x8xf32>
    %cst_26 = arith.constant dense<0xFF800000> : vector<4x8xf32>
    %82 = vector.multi_reduction <maximumf>, %81, %cst_26 [2] : vector<4x8x8xf32> to vector<4x8xf32>
    %83 = vector.shape_cast %82 : vector<4x8xf32> to vector<4x8x1xf32>
    %84 = vector.broadcast %83 : vector<4x8x1xf32> to vector<4x8x8xf32>
    %85 = arith.subf %81, %84 : vector<4x8x8xf32>
    %86 = math.exp %85 : vector<4x8x8xf32>
    %cst_27 = arith.constant dense<0.000000e+00> : vector<4x8xf32>
    %87 = vector.multi_reduction <add>, %86, %cst_27 [2] : vector<4x8x8xf32> to vector<4x8xf32>
    %88 = vector.shape_cast %87 : vector<4x8xf32> to vector<4x8x1xf32>
    %89 = vector.broadcast %88 : vector<4x8x1xf32> to vector<4x8x8xf32>
    %90 = arith.divf %86, %89 : vector<4x8x8xf32>
    %c0_28 = arith.constant 0 : index
    %c0_29 = arith.constant 0 : index
    %c0_30 = arith.constant 0 : index
    %c0_31 = arith.constant 0 : index
    %91 = vector.load %arg7[%c0_28, %c0_29, %c0_30, %c0_31] : memref<1x4x8x8xf32, #tpu.memory_space<vmem>>, vector<1x4x8x8xf32>
    %92 = vector.shape_cast %91 : vector<1x4x8x8xf32> to vector<4x8x8xf32>
    %93 = vector.shape_cast %90 : vector<4x8x8xf32> to vector<1x4x8x8xf32>
    tpu.vector_store %arg7[%c0_28, %c0_29, %c0_30, %c0_31], %93 {strides = array<i32>} : memref<1x4x8x8xf32, #tpu.memory_space<vmem>>, vector<1x4x8x8xf32>,
    "tpu.trace_start"() <{level = 10 : i32, message = "gts,gsd->gtd"}> : () -> ()
    %cst_32 = arith.constant dense<0.000000e+00> : vector<4x8x8xf32>
    %94 = tpu.matmul %90, %78, %cst_32 {dimension_numbers = #tpu.dot_dimension_numbers<[2], [1], [1], [2], [0, 0, 0, 1, 1, 2], [0], [0]>} : vector<4x8x8xf32>, vector<4x8x8xf32>, vector<4x8x8xf32> -> vector<4x8x8xf32>
    "tpu.trace_stop"() : () -> ()
    %95 = vector.extract_strided_slice %94 {offsets = [0, 0, 0], sizes = [1, 8, 8], strides = [1, 1, 1]} : vector<4x8x8xf32> to vector<1x8x8xf32>
    %96 = vector.shape_cast %95 : vector<1x8x8xf32> to vector<8x8xf32>
    %97 = vector.extract_strided_slice %94 {offsets = [1, 0, 0], sizes = [1, 8, 8], strides = [1, 1, 1]} : vector<4x8x8xf32> to vector<1x8x8xf32>
    %98 = vector.shape_cast %97 : vector<1x8x8xf32> to vector<8x8xf32>
    %99 = vector.extract_strided_slice %94 {offsets = [2, 0, 0], sizes = [1, 8, 8], strides = [1, 1, 1]} : vector<4x8x8xf32> to vector<1x8x8xf32>
    %100 = vector.shape_cast %99 : vector<1x8x8xf32> to vector<8x8xf32>
    %101 = vector.extract_strided_slice %94 {offsets = [3, 0, 0], sizes = [1, 8, 8], strides = [1, 1, 1]} : vector<4x8x8xf32> to vector<1x8x8xf32>
    %102 = vector.shape_cast %101 : vector<1x8x8xf32> to vector<8x8xf32>
    %103 = tpu.concatenate %96, %98, %100, %102 in 1 : vector<8x8xf32>, vector<8x8xf32>, vector<8x8xf32>, vector<8x8xf32> -> vector<8x32xf32>
    %c0_33 = arith.constant 0 : index
    %c256 = arith.constant 256 : index
    %104 = vector.load %arg2[%c0_33, %c256] : memref<32x768xf32, #tpu.memory_space<vmem>>, vector<32x32xf32>
    %cst_34 = arith.constant dense<0.000000e+00> : vector<8x32xf32>
    %105 = tpu.matmul %103, %104, %cst_34 {dimension_numbers = #tpu.dot_dimension_numbers<[1], [0], [0], [1], [0, 0, 1, 1], [], []>} : vector<8x32xf32>, vector<32x32xf32>, vector<8x32xf32> -> vector<8x32xf32>
    %c5 = arith.constant 5 : index
    %c0_35 = arith.constant 0 : index
    %106 = vector.load %arg4[%c5, %c0_35] : memref<32x128xf32, #tpu.memory_space<vmem>>, vector<1x32xf32>
    %107 = vector.broadcast %106 : vector<1x32xf32> to vector<8x32xf32>
    %108 = arith.addf %105, %107 : vector<8x32xf32>
    %109 = arith.addf %46, %108 : vector<8x32xf32>
    %c6 = arith.constant 6 : index
    %c0_36 = arith.constant 0 : index
    %110 = vector.load %arg4[%c6, %c0_36] : memref<32x128xf32, #tpu.memory_space<vmem>>, vector<1x32xf32>
    %c7 = arith.constant 7 : index
    %c0_37 = arith.constant 0 : index
    %111 = vector.load %arg4[%c7, %c0_37] : memref<32x128xf32, #tpu.memory_space<vmem>>, vector<1x32xf32>
    %cst_38 = arith.constant dense<0.000000e+00> : vector<8xf32>
    %112 = vector.multi_reduction <add>, %109, %cst_38 [1] : vector<8x32xf32> to vector<8xf32>
    %113 = vector.shape_cast %112 : vector<8xf32> to vector<8x1xf32>
    %cst_39 = arith.constant 3.200000e+01 : f32
    %114 = vector.broadcast %cst_39 : f32 to vector<8x1xf32>
    %115 = arith.divf %113, %114 : vector<8x1xf32>
    %116 = vector.broadcast %115 : vector<8x1xf32> to vector<8x32xf32>
    %117 = arith.subf %109, %116 : vector<8x32xf32>
    %118 = arith.mulf %117, %117 : vector<8x32xf32>
    %cst_40 = arith.constant dense<0.000000e+00> : vector<8xf32>
    %119 = vector.multi_reduction <add>, %118, %cst_40 [1] : vector<8x32xf32> to vector<8xf32>
    %120 = vector.shape_cast %119 : vector<8xf32> to vector<8x1xf32>
    %cst_41 = arith.constant 3.200000e+01 : f32
    %121 = vector.broadcast %cst_41 : f32 to vector<8x1xf32>
    %122 = arith.divf %120, %121 : vector<8x1xf32>
    %123 = vector.broadcast %115 : vector<8x1xf32> to vector<8x32xf32>
    %124 = arith.subf %109, %123 : vector<8x32xf32>
    %cst_42 = arith.constant 9.99999997E-7 : f32
    %125 = vector.broadcast %cst_42 : f32 to vector<8x1xf32>
    %126 = arith.addf %122, %125 : vector<8x1xf32>
    %127 = math.rsqrt %126 : vector<8x1xf32>
    %128 = vector.broadcast %127 : vector<8x1xf32> to vector<8x32xf32>
    %129 = arith.mulf %124, %128 : vector<8x32xf32>
    %130 = vector.broadcast %110 : vector<1x32xf32> to vector<8x32xf32>
    %131 = arith.mulf %129, %130 : vector<8x32xf32>
    %132 = vector.broadcast %111 : vector<1x32xf32> to vector<8x32xf32>
    %133 = arith.addf %131, %132 : vector<8x32xf32>
    %c0_43 = arith.constant 0 : index
    %c0_44 = arith.constant 0 : index
    %c0_45 = arith.constant 0 : index
    %134 = vector.load %arg6[%c0_43, %c0_44, %c0_45] : memref<1x8x32xf32, #tpu.memory_space<vmem>>, vector<1x8x32xf32>
    %135 = vector.shape_cast %134 : vector<1x8x32xf32> to vector<8x32xf32>
    %136 = vector.shape_cast %133 : vector<8x32xf32> to vector<1x8x32xf32>
    tpu.vector_store %arg6[%c0_43, %c0_44, %c0_45], %136 {strides = array<i32>} : memref<1x8x32xf32, #tpu.memory_space<vmem>>, vector<1x8x32xf32>,
    %c0_46 = arith.constant 0 : index
    %c384 = arith.constant 384 : index
    %137 = vector.load %arg2[%c0_46, %c384] : memref<32x768xf32, #tpu.memory_space<vmem>>, vector<32x64xf32>
    %cst_47 = arith.constant dense<0.000000e+00> : vector<8x64xf32>
    %138 = tpu.matmul %133, %137, %cst_47 {dimension_numbers = #tpu.dot_dimension_numbers<[1], [0], [0], [1], [0, 0, 1, 1], [], []>} : vector<8x32xf32>, vector<32x64xf32>, vector<8x64xf32> -> vector<8x64xf32>
    %c8 = arith.constant 8 : index
    %c0_48 = arith.constant 0 : index
    %139 = vector.load %arg4[%c8, %c0_48] : memref<32x128xf32, #tpu.memory_space<vmem>>, vector<1x64xf32>
    %140 = vector.broadcast %139 : vector<1x64xf32> to vector<8x64xf32>
    %141 = arith.addf %138, %140 : vector<8x64xf32>
    %142 = vector.extract_strided_slice %141 {offsets = [0, 0], sizes = [8, 32], strides = [1, 1]} : vector<8x64xf32> to vector<8x32xf32>
    %143 = vector.extract_strided_slice %141 {offsets = [0, 32], sizes = [8, 32], strides = [1, 1]} : vector<8x64xf32> to vector<8x32xf32>
    %cst_49 = arith.constant 5.000000e-01 : f32
    %144 = vector.broadcast %cst_49 : f32 to vector<8x32xf32>
    %145 = arith.mulf %144, %143 : vector<8x32xf32>
    %146 = math.tanh %145 : vector<8x32xf32>
    %cst_50 = arith.constant 1.000000e+00 : f32
    %147 = vector.broadcast %cst_50 : f32 to vector<8x32xf32>
    %148 = arith.addf %146, %147 : vector<8x32xf32>
    %cst_51 = arith.constant 5.000000e-01 : f32
    %149 = vector.broadcast %cst_51 : f32 to vector<8x32xf32>
    %150 = arith.mulf %149, %148 : vector<8x32xf32>
    %151 = arith.mulf %142, %150 : vector<8x32xf32>
    %cst_52 = arith.constant 0.000000e+00 : f32
    %152 = vector.broadcast %cst_52 : f32 to vector<7x32xf32>
    %c0_53 = arith.constant 0 : index
    %c0_54 = arith.constant 0 : index
    %c0_55 = arith.constant 0 : index
    %153 = vector.load %arg8[%c0_53, %c0_54, %c0_55] : memref<1x24x32xf32, #tpu.memory_space<vmem>>, vector<1x7x32xf32>
    %154 = vector.shape_cast %153 : vector<1x7x32xf32> to vector<7x32xf32>
    %155 = vector.shape_cast %152 : vector<7x32xf32> to vector<1x7x32xf32>
    tpu.vector_store %arg8[%c0_53, %c0_54, %c0_55], %155 {strides = array<i32>} : memref<1x24x32xf32, #tpu.memory_space<vmem>>, vector<1x7x32xf32>,
    %cst_56 = arith.constant 0.000000e+00 : f32
    %156 = vector.broadcast %cst_56 : f32 to vector<9x32xf32>
    %c0_57 = arith.constant 0 : index
    %c15 = arith.constant 15 : index
    %c0_58 = arith.constant 0 : index
    %157 = vector.load %arg8[%c0_57, %c15, %c0_58] : memref<1x24x32xf32, #tpu.memory_space<vmem>>, vector<1x9x32xf32>
    %158 = vector.shape_cast %157 : vector<1x9x32xf32> to vector<9x32xf32>
    %159 = vector.shape_cast %156 : vector<9x32xf32> to vector<1x9x32xf32>
    tpu.vector_store %arg8[%c0_57, %c15, %c0_58], %159 {strides = array<i32>} : memref<1x24x32xf32, #tpu.memory_space<vmem>>, vector<1x9x32xf32>,
    %c0_59 = arith.constant 0 : index
    %c7_60 = arith.constant 7 : index
    %c0_61 = arith.constant 0 : index
    %160 = vector.load %arg8[%c0_59, %c7_60, %c0_61] : memref<1x24x32xf32, #tpu.memory_space<vmem>>, vector<1x8x32xf32>
    %161 = vector.shape_cast %160 : vector<1x8x32xf32> to vector<8x32xf32>
    %162 = vector.shape_cast %151 : vector<8x32xf32> to vector<1x8x32xf32>
    tpu.vector_store %arg8[%c0_59, %c7_60, %c0_61], %162 {strides = array<i32>} : memref<1x24x32xf32, #tpu.memory_space<vmem>>, vector<1x8x32xf32>,
    %cst_62 = arith.constant 0.000000e+00 : f32
    %163 = vector.broadcast %cst_62 : f32 to vector<8x32xf32>
    %cst_63 = arith.constant 0.000000e+00 : f32
    %164 = vector.broadcast %cst_63 : f32 to vector<8x32xf32>
    %cst_64 = arith.constant 0.000000e+00 : f32
    %165 = vector.broadcast %cst_64 : f32 to vector<8x32xf32>
    %cst_65 = arith.constant 0.000000e+00 : f32
    %166 = vector.broadcast %cst_65 : f32 to vector<8x32xf32>
    %c0_66 = arith.constant 0 : index
    %c0_67 = arith.constant 0 : index
    %c0_68 = arith.constant 0 : index
    %167 = vector.load %arg8[%c0_66, %c0_67, %c0_68] : memref<1x24x32xf32, #tpu.memory_space<vmem>>, vector<1x8x32xf32>
    %168 = vector.shape_cast %167 : vector<1x8x32xf32> to vector<8x32xf32>
    %c17 = arith.constant 17 : index
    %c0_69 = arith.constant 0 : index
    %169 = vector.load %arg4[%c17, %c0_69] : memref<32x128xf32, #tpu.memory_space<vmem>>, vector<1x32xf32>
    %170 = vector.broadcast %169 : vector<1x32xf32> to vector<8x32xf32>
    %171 = arith.mulf %168, %170 : vector<8x32xf32>
    %172 = arith.addf %163, %171 : vector<8x32xf32>
    %c0_70 = arith.constant 0 : index
    %c1_71 = arith.constant 1 : index
    %c0_72 = arith.constant 0 : index
    %173 = vector.load %arg8[%c0_70, %c1_71, %c0_72] : memref<1x24x32xf32, #tpu.memory_space<vmem>>, vector<1x8x32xf32>
    %174 = vector.shape_cast %173 : vector<1x8x32xf32> to vector<8x32xf32>
    %c18 = arith.constant 18 : index
    %c0_73 = arith.constant 0 : index
    %175 = vector.load %arg4[%c18, %c0_73] : memref<32x128xf32, #tpu.memory_space<vmem>>, vector<1x32xf32>
    %176 = vector.broadcast %175 : vector<1x32xf32> to vector<8x32xf32>
    %177 = arith.mulf %174, %176 : vector<8x32xf32>
    %178 = arith.addf %164, %177 : vector<8x32xf32>
    %c0_74 = arith.constant 0 : index
    %c2_75 = arith.constant 2 : index
    %c0_76 = arith.constant 0 : index
    %179 = vector.load %arg8[%c0_74, %c2_75, %c0_76] : memref<1x24x32xf32, #tpu.memory_space<vmem>>, vector<1x8x32xf32>
    %180 = vector.shape_cast %179 : vector<1x8x32xf32> to vector<8x32xf32>
    %c19 = arith.constant 19 : index
    %c0_77 = arith.constant 0 : index
    %181 = vector.load %arg4[%c19, %c0_77] : memref<32x128xf32, #tpu.memory_space<vmem>>, vector<1x32xf32>
    %182 = vector.broadcast %181 : vector<1x32xf32> to vector<8x32xf32>
    %183 = arith.mulf %180, %182 : vector<8x32xf32>
    %184 = arith.addf %165, %183 : vector<8x32xf32>
    %c0_78 = arith.constant 0 : index
    %c3_79 = arith.constant 3 : index
    %c0_80 = arith.constant 0 : index
    %185 = vector.load %arg8[%c0_78, %c3_79, %c0_80] : memref<1x24x32xf32, #tpu.memory_space<vmem>>, vector<1x8x32xf32>
    %186 = vector.shape_cast %185 : vector<1x8x32xf32> to vector<8x32xf32>
    %c20 = arith.constant 20 : index
    %c0_81 = arith.constant 0 : index
    %187 = vector.load %arg4[%c20, %c0_81] : memref<32x128xf32, #tpu.memory_space<vmem>>, vector<1x32xf32>
    %188 = vector.broadcast %187 : vector<1x32xf32> to vector<8x32xf32>
    %189 = arith.mulf %186, %188 : vector<8x32xf32>
    %190 = arith.addf %166, %189 : vector<8x32xf32>
    %c0_82 = arith.constant 0 : index
    %c4_83 = arith.constant 4 : index
    %c0_84 = arith.constant 0 : index
    %191 = vector.load %arg8[%c0_82, %c4_83, %c0_84] : memref<1x24x32xf32, #tpu.memory_space<vmem>>, vector<1x8x32xf32>
    %192 = vector.shape_cast %191 : vector<1x8x32xf32> to vector<8x32xf32>
    %c21 = arith.constant 21 : index
    %c0_85 = arith.constant 0 : index
    %193 = vector.load %arg4[%c21, %c0_85] : memref<32x128xf32, #tpu.memory_space<vmem>>, vector<1x32xf32>
    %194 = vector.broadcast %193 : vector<1x32xf32> to vector<8x32xf32>
    %195 = arith.mulf %192, %194 : vector<8x32xf32>
    %196 = arith.addf %172, %195 : vector<8x32xf32>
    %c0_86 = arith.constant 0 : index
    %c5_87 = arith.constant 5 : index
    %c0_88 = arith.constant 0 : index
    %197 = vector.load %arg8[%c0_86, %c5_87, %c0_88] : memref<1x24x32xf32, #tpu.memory_space<vmem>>, vector<1x8x32xf32>
    %198 = vector.shape_cast %197 : vector<1x8x32xf32> to vector<8x32xf32>
    %c22 = arith.constant 22 : index
    %c0_89 = arith.constant 0 : index
    %199 = vector.load %arg4[%c22, %c0_89] : memref<32x128xf32, #tpu.memory_space<vmem>>, vector<1x32xf32>
    %200 = vector.broadcast %199 : vector<1x32xf32> to vector<8x32xf32>
    %201 = arith.mulf %198, %200 : vector<8x32xf32>
    %202 = arith.addf %178, %201 : vector<8x32xf32>
    %c0_90 = arith.constant 0 : index
    %c6_91 = arith.constant 6 : index
    %c0_92 = arith.constant 0 : index
    %203 = vector.load %arg8[%c0_90, %c6_91, %c0_92] : memref<1x24x32xf32, #tpu.memory_space<vmem>>, vector<1x8x32xf32>
    %204 = vector.shape_cast %203 : vector<1x8x32xf32> to vector<8x32xf32>
    %c23 = arith.constant 23 : index
    %c0_93 = arith.constant 0 : index
    %205 = vector.load %arg4[%c23, %c0_93] : memref<32x128xf32, #tpu.memory_space<vmem>>, vector<1x32xf32>
    %206 = vector.broadcast %205 : vector<1x32xf32> to vector<8x32xf32>
    %207 = arith.mulf %204, %206 : vector<8x32xf32>
    %208 = arith.addf %184, %207 : vector<8x32xf32>
    %c0_94 = arith.constant 0 : index
    %c7_95 = arith.constant 7 : index
    %c0_96 = arith.constant 0 : index
    %209 = vector.load %arg8[%c0_94, %c7_95, %c0_96] : memref<1x24x32xf32, #tpu.memory_space<vmem>>, vector<1x8x32xf32>
    %210 = vector.shape_cast %209 : vector<1x8x32xf32> to vector<8x32xf32>
    %c24 = arith.constant 24 : index
    %c0_97 = arith.constant 0 : index
    %211 = vector.load %arg4[%c24, %c0_97] : memref<32x128xf32, #tpu.memory_space<vmem>>, vector<1x32xf32>
    %212 = vector.broadcast %211 : vector<1x32xf32> to vector<8x32xf32>
    %213 = arith.mulf %210, %212 : vector<8x32xf32>
    %214 = arith.addf %190, %213 : vector<8x32xf32>
    %c0_98 = arith.constant 0 : index
    %c8_99 = arith.constant 8 : index
    %c0_100 = arith.constant 0 : index
    %215 = vector.load %arg8[%c0_98, %c8_99, %c0_100] : memref<1x24x32xf32, #tpu.memory_space<vmem>>, vector<1x8x32xf32>
    %216 = vector.shape_cast %215 : vector<1x8x32xf32> to vector<8x32xf32>
    %c25 = arith.constant 25 : index
    %c0_101 = arith.constant 0 : index
    %217 = vector.load %arg4[%c25, %c0_101] : memref<32x128xf32, #tpu.memory_space<vmem>>, vector<1x32xf32>
    %218 = vector.broadcast %217 : vector<1x32xf32> to vector<8x32xf32>
    %219 = arith.mulf %216, %218 : vector<8x32xf32>
    %220 = arith.addf %196, %219 : vector<8x32xf32>
    %c0_102 = arith.constant 0 : index
    %c9 = arith.constant 9 : index
    %c0_103 = arith.constant 0 : index
    %221 = vector.load %arg8[%c0_102, %c9, %c0_103] : memref<1x24x32xf32, #tpu.memory_space<vmem>>, vector<1x8x32xf32>
    %222 = vector.shape_cast %221 : vector<1x8x32xf32> to vector<8x32xf32>
    %c26 = arith.constant 26 : index
    %c0_104 = arith.constant 0 : index
    %223 = vector.load %arg4[%c26, %c0_104] : memref<32x128xf32, #tpu.memory_space<vmem>>, vector<1x32xf32>
    %224 = vector.broadcast %223 : vector<1x32xf32> to vector<8x32xf32>
    %225 = arith.mulf %222, %224 : vector<8x32xf32>
    %226 = arith.addf %202, %225 : vector<8x32xf32>
    %c0_105 = arith.constant 0 : index
    %c10 = arith.constant 10 : index
    %c0_106 = arith.constant 0 : index
    %227 = vector.load %arg8[%c0_105, %c10, %c0_106] : memref<1x24x32xf32, #tpu.memory_space<vmem>>, vector<1x8x32xf32>
    %228 = vector.shape_cast %227 : vector<1x8x32xf32> to vector<8x32xf32>
    %c27 = arith.constant 27 : index
    %c0_107 = arith.constant 0 : index
    %229 = vector.load %arg4[%c27, %c0_107] : memref<32x128xf32, #tpu.memory_space<vmem>>, vector<1x32xf32>
    %230 = vector.broadcast %229 : vector<1x32xf32> to vector<8x32xf32>
    %231 = arith.mulf %228, %230 : vector<8x32xf32>
    %232 = arith.addf %208, %231 : vector<8x32xf32>
    %c0_108 = arith.constant 0 : index
    %c11 = arith.constant 11 : index
    %c0_109 = arith.constant 0 : index
    %233 = vector.load %arg8[%c0_108, %c11, %c0_109] : memref<1x24x32xf32, #tpu.memory_space<vmem>>, vector<1x8x32xf32>
    %234 = vector.shape_cast %233 : vector<1x8x32xf32> to vector<8x32xf32>
    %c28 = arith.constant 28 : index
    %c0_110 = arith.constant 0 : index
    %235 = vector.load %arg4[%c28, %c0_110] : memref<32x128xf32, #tpu.memory_space<vmem>>, vector<1x32xf32>
    %236 = vector.broadcast %235 : vector<1x32xf32> to vector<8x32xf32>
    %237 = arith.mulf %234, %236 : vector<8x32xf32>
    %238 = arith.addf %214, %237 : vector<8x32xf32>
    %c0_111 = arith.constant 0 : index
    %c12 = arith.constant 12 : index
    %c0_112 = arith.constant 0 : index
    %239 = vector.load %arg8[%c0_111, %c12, %c0_112] : memref<1x24x32xf32, #tpu.memory_space<vmem>>, vector<1x8x32xf32>
    %240 = vector.shape_cast %239 : vector<1x8x32xf32> to vector<8x32xf32>
    %c29 = arith.constant 29 : index
    %c0_113 = arith.constant 0 : index
    %241 = vector.load %arg4[%c29, %c0_113] : memref<32x128xf32, #tpu.memory_space<vmem>>, vector<1x32xf32>
    %242 = vector.broadcast %241 : vector<1x32xf32> to vector<8x32xf32>
    %243 = arith.mulf %240, %242 : vector<8x32xf32>
    %244 = arith.addf %220, %243 : vector<8x32xf32>
    %c0_114 = arith.constant 0 : index
    %c13 = arith.constant 13 : index
    %c0_115 = arith.constant 0 : index
    %245 = vector.load %arg8[%c0_114, %c13, %c0_115] : memref<1x24x32xf32, #tpu.memory_space<vmem>>, vector<1x8x32xf32>
    %246 = vector.shape_cast %245 : vector<1x8x32xf32> to vector<8x32xf32>
    %c30 = arith.constant 30 : index
    %c0_116 = arith.constant 0 : index
    %247 = vector.load %arg4[%c30, %c0_116] : memref<32x128xf32, #tpu.memory_space<vmem>>, vector<1x32xf32>
    %248 = vector.broadcast %247 : vector<1x32xf32> to vector<8x32xf32>
    %249 = arith.mulf %246, %248 : vector<8x32xf32>
    %250 = arith.addf %226, %249 : vector<8x32xf32>
    %c0_117 = arith.constant 0 : index
    %c14 = arith.constant 14 : index
    %c0_118 = arith.constant 0 : index
    %251 = vector.load %arg8[%c0_117, %c14, %c0_118] : memref<1x24x32xf32, #tpu.memory_space<vmem>>, vector<1x8x32xf32>
    %252 = vector.shape_cast %251 : vector<1x8x32xf32> to vector<8x32xf32>
    %c31 = arith.constant 31 : index
    %c0_119 = arith.constant 0 : index
    %253 = vector.load %arg4[%c31, %c0_119] : memref<32x128xf32, #tpu.memory_space<vmem>>, vector<1x32xf32>
    %254 = vector.broadcast %253 : vector<1x32xf32> to vector<8x32xf32>
    %255 = arith.mulf %252, %254 : vector<8x32xf32>
    %256 = arith.addf %232, %255 : vector<8x32xf32>
    %257 = arith.addf %244, %250 : vector<8x32xf32>
    %258 = arith.addf %256, %238 : vector<8x32xf32>
    %259 = arith.addf %257, %258 : vector<8x32xf32>
    %c9_120 = arith.constant 9 : index
    %c0_121 = arith.constant 0 : index
    %260 = vector.load %arg4[%c9_120, %c0_121] : memref<32x128xf32, #tpu.memory_space<vmem>>, vector<1x32xf32>
    %261 = vector.broadcast %260 : vector<1x32xf32> to vector<8x32xf32>
    %262 = arith.addf %259, %261 : vector<8x32xf32>
    %cst_122 = arith.constant 5.000000e-01 : f32
    %263 = vector.broadcast %cst_122 : f32 to vector<8x32xf32>
    %264 = arith.mulf %263, %262 : vector<8x32xf32>
    %265 = math.tanh %264 : vector<8x32xf32>
    %cst_123 = arith.constant 1.000000e+00 : f32
    %266 = vector.broadcast %cst_123 : f32 to vector<8x32xf32>
    %267 = arith.addf %265, %266 : vector<8x32xf32>
    %cst_124 = arith.constant 5.000000e-01 : f32
    %268 = vector.broadcast %cst_124 : f32 to vector<8x32xf32>
    %269 = arith.mulf %268, %267 : vector<8x32xf32>
    %270 = arith.mulf %262, %269 : vector<8x32xf32>
    %c0_125 = arith.constant 0 : index
    %c512 = arith.constant 512 : index
    %271 = vector.load %arg2[%c0_125, %c512] : memref<32x768xf32, #tpu.memory_space<vmem>>, vector<32x32xf32>
    %cst_126 = arith.constant dense<0.000000e+00> : vector<8x32xf32>
    %272 = tpu.matmul %270, %271, %cst_126 {dimension_numbers = #tpu.dot_dimension_numbers<[1], [0], [0], [1], [0, 0, 1, 1], [], []>} : vector<8x32xf32>, vector<32x32xf32>, vector<8x32xf32> -> vector<8x32xf32>
    %c10_127 = arith.constant 10 : index
    %c0_128 = arith.constant 0 : index
    %273 = vector.load %arg4[%c10_127, %c0_128] : memref<32x128xf32, #tpu.memory_space<vmem>>, vector<1x32xf32>
    %274 = vector.broadcast %273 : vector<1x32xf32> to vector<8x32xf32>
    %275 = arith.addf %272, %274 : vector<8x32xf32>
    %276 = arith.addf %133, %275 : vector<8x32xf32>
    %c11_129 = arith.constant 11 : index
    %c0_130 = arith.constant 0 : index
    %277 = vector.load %arg4[%c11_129, %c0_130] : memref<32x128xf32, #tpu.memory_space<vmem>>, vector<1x32xf32>
    %c12_131 = arith.constant 12 : index
    %c0_132 = arith.constant 0 : index
    %278 = vector.load %arg4[%c12_131, %c0_132] : memref<32x128xf32, #tpu.memory_space<vmem>>, vector<1x32xf32>
    %cst_133 = arith.constant dense<0.000000e+00> : vector<8xf32>
    %279 = vector.multi_reduction <add>, %276, %cst_133 [1] : vector<8x32xf32> to vector<8xf32>
    %280 = vector.shape_cast %279 : vector<8xf32> to vector<8x1xf32>
    %cst_134 = arith.constant 3.200000e+01 : f32
    %281 = vector.broadcast %cst_134 : f32 to vector<8x1xf32>
    %282 = arith.divf %280, %281 : vector<8x1xf32>
    %283 = vector.broadcast %282 : vector<8x1xf32> to vector<8x32xf32>
    %284 = arith.subf %276, %283 : vector<8x32xf32>
    %285 = arith.mulf %284, %284 : vector<8x32xf32>
    %cst_135 = arith.constant dense<0.000000e+00> : vector<8xf32>
    %286 = vector.multi_reduction <add>, %285, %cst_135 [1] : vector<8x32xf32> to vector<8xf32>
    %287 = vector.shape_cast %286 : vector<8xf32> to vector<8x1xf32>
    %cst_136 = arith.constant 3.200000e+01 : f32
    %288 = vector.broadcast %cst_136 : f32 to vector<8x1xf32>
    %289 = arith.divf %287, %288 : vector<8x1xf32>
    %290 = vector.broadcast %282 : vector<8x1xf32> to vector<8x32xf32>
    %291 = arith.subf %276, %290 : vector<8x32xf32>
    %cst_137 = arith.constant 9.99999997E-7 : f32
    %292 = vector.broadcast %cst_137 : f32 to vector<8x1xf32>
    %293 = arith.addf %289, %292 : vector<8x1xf32>
    %294 = math.rsqrt %293 : vector<8x1xf32>
    %295 = vector.broadcast %294 : vector<8x1xf32> to vector<8x32xf32>
    %296 = arith.mulf %291, %295 : vector<8x32xf32>
    %297 = vector.broadcast %277 : vector<1x32xf32> to vector<8x32xf32>
    %298 = arith.mulf %296, %297 : vector<8x32xf32>
    %299 = vector.broadcast %278 : vector<1x32xf32> to vector<8x32xf32>
    %300 = arith.addf %298, %299 : vector<8x32xf32>
    %c0_138 = arith.constant 0 : index
    %c640 = arith.constant 640 : index
    %301 = vector.load %arg2[%c0_138, %c640] : memref<32x768xf32, #tpu.memory_space<vmem>>, vector<32x64xf32>
    %cst_139 = arith.constant dense<0.000000e+00> : vector<8x64xf32>
    %302 = tpu.matmul %300, %301, %cst_139 {dimension_numbers = #tpu.dot_dimension_numbers<[1], [0], [0], [1], [0, 0, 1, 1], [], []>} : vector<8x32xf32>, vector<32x64xf32>, vector<8x64xf32> -> vector<8x64xf32>
    %c13_140 = arith.constant 13 : index
    %c0_141 = arith.constant 0 : index
    %303 = vector.load %arg4[%c13_140, %c0_141] : memref<32x128xf32, #tpu.memory_space<vmem>>, vector<1x64xf32>
    %304 = vector.broadcast %303 : vector<1x64xf32> to vector<8x64xf32>
    %305 = arith.addf %302, %304 : vector<8x64xf32>
    %cst_142 = arith.constant 5.000000e-01 : f32
    %306 = vector.broadcast %cst_142 : f32 to vector<8x64xf32>
    %307 = arith.mulf %306, %305 : vector<8x64xf32>
    %308 = math.tanh %307 : vector<8x64xf32>
    %cst_143 = arith.constant 1.000000e+00 : f32
    %309 = vector.broadcast %cst_143 : f32 to vector<8x64xf32>
    %310 = arith.addf %308, %309 : vector<8x64xf32>
    %cst_144 = arith.constant 5.000000e-01 : f32
    %311 = vector.broadcast %cst_144 : f32 to vector<8x64xf32>
    %312 = arith.mulf %311, %310 : vector<8x64xf32>
    %313 = arith.mulf %305, %312 : vector<8x64xf32>
    %c0_145 = arith.constant 0 : index
    %c128_146 = arith.constant 128 : index
    %314 = vector.load %arg3[%c0_145, %c128_146] : memref<64x256xf32, #tpu.memory_space<vmem>>, vector<64x32xf32>
    %cst_147 = arith.constant dense<0.000000e+00> : vector<8x32xf32>
    %315 = tpu.matmul %313, %314, %cst_147 {dimension_numbers = #tpu.dot_dimension_numbers<[1], [0], [0], [1], [0, 0, 1, 1], [], []>} : vector<8x64xf32>, vector<64x32xf32>, vector<8x32xf32> -> vector<8x32xf32>
    %c14_148 = arith.constant 14 : index
    %c0_149 = arith.constant 0 : index
    %316 = vector.load %arg4[%c14_148, %c0_149] : memref<32x128xf32, #tpu.memory_space<vmem>>, vector<1x32xf32>
    %317 = vector.broadcast %316 : vector<1x32xf32> to vector<8x32xf32>
    %318 = arith.addf %315, %317 : vector<8x32xf32>
    %cst_150 = arith.constant 5.000000e-01 : f32
    %319 = vector.broadcast %cst_150 : f32 to vector<8x32xf32>
    %320 = arith.mulf %319, %318 : vector<8x32xf32>
    %321 = arith.addf %300, %320 : vector<8x32xf32>
    %c15_151 = arith.constant 15 : index
    %c0_152 = arith.constant 0 : index
    %322 = vector.load %arg4[%c15_151, %c0_152] : memref<32x128xf32, #tpu.memory_space<vmem>>, vector<1x32xf32>
    %c16 = arith.constant 16 : index
    %c0_153 = arith.constant 0 : index
    %323 = vector.load %arg4[%c16, %c0_153] : memref<32x128xf32, #tpu.memory_space<vmem>>, vector<1x32xf32>
    %cst_154 = arith.constant dense<0.000000e+00> : vector<8xf32>
    %324 = vector.multi_reduction <add>, %321, %cst_154 [1] : vector<8x32xf32> to vector<8xf32>
    %325 = vector.shape_cast %324 : vector<8xf32> to vector<8x1xf32>
    %cst_155 = arith.constant 3.200000e+01 : f32
    %326 = vector.broadcast %cst_155 : f32 to vector<8x1xf32>
    %327 = arith.divf %325, %326 : vector<8x1xf32>
    %328 = vector.broadcast %327 : vector<8x1xf32> to vector<8x32xf32>
    %329 = arith.subf %321, %328 : vector<8x32xf32>
    %330 = arith.mulf %329, %329 : vector<8x32xf32>
    %cst_156 = arith.constant dense<0.000000e+00> : vector<8xf32>
    %331 = vector.multi_reduction <add>, %330, %cst_156 [1] : vector<8x32xf32> to vector<8xf32>
    %332 = vector.shape_cast %331 : vector<8xf32> to vector<8x1xf32>
    %cst_157 = arith.constant 3.200000e+01 : f32
    %333 = vector.broadcast %cst_157 : f32 to vector<8x1xf32>
    %334 = arith.divf %332, %333 : vector<8x1xf32>
    %335 = vector.broadcast %327 : vector<8x1xf32> to vector<8x32xf32>
    %336 = arith.subf %321, %335 : vector<8x32xf32>
    %cst_158 = arith.constant 9.99999997E-7 : f32
    %337 = vector.broadcast %cst_158 : f32 to vector<8x1xf32>
    %338 = arith.addf %334, %337 : vector<8x1xf32>
    %339 = math.rsqrt %338 : vector<8x1xf32>
    %340 = vector.broadcast %339 : vector<8x1xf32> to vector<8x32xf32>
    %341 = arith.mulf %336, %340 : vector<8x32xf32>
    %342 = vector.broadcast %322 : vector<1x32xf32> to vector<8x32xf32>
    %343 = arith.mulf %341, %342 : vector<8x32xf32>
    %344 = vector.broadcast %323 : vector<1x32xf32> to vector<8x32xf32>
    %345 = arith.addf %343, %344 : vector<8x32xf32>
    %c0_159 = arith.constant 0 : index
    %c0_160 = arith.constant 0 : index
    %c0_161 = arith.constant 0 : index
    %346 = vector.load %arg5[%c0_159, %c0_160, %c0_161] : memref<1x8x32xf32, #tpu.memory_space<vmem>>, vector<1x8x32xf32>
    %347 = vector.shape_cast %346 : vector<1x8x32xf32> to vector<8x32xf32>
    %348 = vector.shape_cast %345 : vector<8x32xf32> to vector<1x8x32xf32>
    tpu.vector_store %arg5[%c0_159, %c0_160, %c0_161], %348 {strides = array<i32>} : memref<1x8x32xf32, #tpu.memory_space<vmem>>, vector<1x8x32xf32>,
    return
  }
  func.func @transform_0(%arg0: i32) -> (i32, i32, i32) {
    %c0_i32 = arith.constant 0 : i32
    %c0_i32_0 = arith.constant 0 : i32
    %c0_i32_1 = arith.constant 0 : i32
    return %arg0, %c0_i32, %c0_i32_0 : i32, i32, i32
  }
  func.func @transform_1(%arg0: i32) -> (i32, i32) {
    %c0_i32 = arith.constant 0 : i32
    %c0_i32_0 = arith.constant 0 : i32
    %c0_i32_1 = arith.constant 0 : i32
    return %c0_i32, %c0_i32_0 : i32, i32
  }
  func.func @transform_2(%arg0: i32) -> (i32, i32) {
    %c0_i32 = arith.constant 0 : i32
    %c0_i32_0 = arith.constant 0 : i32
    %c0_i32_1 = arith.constant 0 : i32
    return %c0_i32, %c0_i32_0 : i32, i32
  }
  func.func @transform_3(%arg0: i32) -> (i32, i32) {
    %c0_i32 = arith.constant 0 : i32
    %c0_i32_0 = arith.constant 0 : i32
    %c0_i32_1 = arith.constant 0 : i32
    return %c0_i32, %c0_i32_0 : i32, i32
  }
  func.func @transform_4(%arg0: i32) -> (i32, i32, i32) {
    %c0_i32 = arith.constant 0 : i32
    %c0_i32_0 = arith.constant 0 : i32
    %c0_i32_1 = arith.constant 0 : i32
    return %arg0, %c0_i32, %c0_i32_0 : i32, i32, i32
  }
  func.func @transform_5(%arg0: i32) -> (i32, i32, i32) {
    %c0_i32 = arith.constant 0 : i32
    %c0_i32_0 = arith.constant 0 : i32
    %c0_i32_1 = arith.constant 0 : i32
    return %arg0, %c0_i32, %c0_i32_0 : i32, i32, i32
  }
  func.func @transform_6(%arg0: i32) -> (i32, i32, i32, i32) {
    %c0_i32 = arith.constant 0 : i32
    %c0_i32_0 = arith.constant 0 : i32
    %c0_i32_1 = arith.constant 0 : i32
    %c0_i32_2 = arith.constant 0 : i32
    return %arg0, %c0_i32, %c0_i32_0, %c0_i32_1 : i32, i32, i32, i32
  }
}

</mosaic_0001>

<bundles_post_ra>
// kernel: conformer_encoder_layer.1
= control target key start
LH: loop header
LB: loop body
LE: loop exit
PB: predicated region body
PF: predicated region fallthrough
CT: control target
= control target key end

     0   :  { %12 = vsyncpa [#allocation4], 0  ;;  %s3141_s0 = inlined_call_operand.vmem [shape: f32[2,8,32], index: 0, kind: input, shape index: {}]   ;;  %s3142_s1 = inlined_call_operand.vmem [shape: f32[32,768], index: 1, kind: input, shape index: {}]   ;;  %s3143_s2 = inlined_call_operand.vmem [shape: f32[64,256], index: 2, kind: input, shape index: {}]   ;;  %s3144_s3 = inlined_call_operand.vmem [shape: f32[32,128], index: 3, kind: input, shape index: {}]   ;;  %s3145_s4 = inlined_call_operand.hbm [shape: f32[2,8,32], index: 4, kind: output, shape index: {0}]   ;;  %s3146_s5 = inlined_call_operand.hbm [shape: f32[2,8,32], index: 5, kind: output, shape index: {1}]   ;;  %s3147_s6 = inlined_call_operand.hbm [shape: f32[2,4,8,8], index: 6, kind: output, shape index: {2}]  }
   0x1   :  { %14 = vsyncpa [#allocation4 + $0x1], 0 }
   0x2   :  { %15 = vsyncpa [#allocation6], 0 }
   0x3   :  { %17 = vsyncpa [#allocation6 + $0x1], 0  ;;  %s2595_s21 = smov 0   ;;  %s2597_s22 = smov 0  }
   0x4   :  { %s2599_s23 = smov 0   ;;  %s2601_s24 = smov 0  }
   0x5 LB: > { %s2616_s25 = sadd.s32 4294967295, %s2544_s24   ;;  %s3148_s26 = sadd.s32 4294967294, %s2544_s24   ;;  %s2544_s24 = sphi %s2601_s24, %s3161_s24   ;;  %s2540_s23 = sphi %s2599_s23, %s3160_s23   ;;  %s2536_s22 = sphi %s2597_s22, %s3159_s22   ;;  %s2532_s21 = sphi %s2595_s21, %s3158_s21  }
   0x6   : > { %s2620_s27 = sadd.s32 1, %s2544_s24   ;;  %s119_s28 = sadd.s32 1, %s2540_s23 }
   0x7   : > { %s116_s29 = ssub.s32 %s2544_s24, %s2620_s27  ;;  %p129_p0 = scmp.ne.s32.totalorder %s2540_s23, %s2536_s22 }
   0x8   : > { %p117_p1 = scmp.eq.s32.totalorder %s116_s29, 0  ;;  %p130_p2 = scmp.eq.s32.totalorder %s2616_s25, 1 }
   0x9   : > { %p135_p3 = scmp.ne.s32.totalorder %s2536_s22, %s2532_s21  ;;  %p136_p4 = scmp.eq.s32.totalorder %s3148_s26, 1 }
   0xa   : > { %s2633_s30 = scalar_select %p117_p1, %s2540_s23, %s119_s28  }
   0xb   : > { %p2635_p5 = por %p130_p2, %p129_p0  ;;  %p2639_p6 = por %p136_p4, %p135_p3 }
   0xc   : > { %p2061_p7 = scmp.ge.s32.totalorder %s2544_s24, 1  ;;  %p222_p8 = scmp.lt.s32.totalorder %s2544_s24, 3 }
   0xe   : > { %p223_p9 = pnand %p2061_p7, %p222_p8 }
   0xf   : > { %p261_p10 = scmp.lt.s32.totalorder (!%p223_p9), %s2616_s25, 1  ;;  %s2548_s14 = smov (!%p223_p9), 104  }
  0x10   : > { %226 = sbr.rel (%p223_p9) target bundleno = 4135 (0x1027), region = 36  ;;  %s2549_s15 = smov (!%p223_p9), 120  }
  0x11   : > { %s2551_s17 = smov (!%p223_p9), 96   ;;  %s2552_s18 = smov (!%p223_p9), 64  }
  0x12   : > { %s2804_s19 = sand.u32 (!%p223_p9), 1, %s2536_s22   ;;  %s2556_s29 = smov (!%p223_p9), [#allocation5]  }
  0x13   : > { %s2064_s20 = sshll.u32 (!%p223_p9), %s2804_s19, 5  ;;  %s3149_s10 = sshll.u32 (!%p223_p9), %s2804_s19, 3 }
  0x14   : > { %s2432_s9 = sshll.u32 (!%p223_p9), %s2556_s29, 4  ;;  %s2433_s9 = int_to_ptr.vmem [resolvable:$false] %s2432_s9 }
  0x15   : > { %v269_v0 = vld [vmem:[%s3142_s1 + $0x90] sm:$0xff]  ;;  %v2546_v1 = vmov 0.0   ;;  %v268_v2 = vld [vmem:[%s3142_s1 + $0x60] sm:$0xff]  ;;  %vm2547_vm0 = vmmov 0   ;;  %vm275_vm1 = vcmask 261120   ;;  %s262_s13 = scalar_select %p261_p10, %s2616_s25, 1 }
  0x16   : > { %2192 = vmatprep.subr.mxu1 %v2546_v1  ;;  %2200 = vmatprep.mubr.msk.f32.mxu1 %vm2547_vm0, %v2546_v1  ;;  %1438 = vst.msk [vmem:[#allocation2 + $0xf] sm:$0xff] %vm275_vm1, %v2546_v1  ;;  %v267_v3 = vld [vmem:[%s3142_s1 + $0x30] sm:$0xff]  ;;  %v266_v4 = vld [vmem:[%s3142_s1] sm:$0xff]  ;;  %vm367_vm2 = vcmask 523264   ;;  %v472_v35 = vld [vmem:[%s3142_s1 + $0x98] sm:$0xff]  ;;  %vm560_vm3 = vcmask 64512  }
  0x17   : > { %2193 = vmatpush3.msra.mxu1 %v269_v0  ;;  %2222 = vmatprep.subr.mxu0 %v2546_v1  ;;  %s2065_s16 = sshll.u32 %s262_s13, 3  ;;  %v361_v6 = vld [vmem:[%s3143_s2 + $0x70] sm:$0xff]  ;;  %v360_v7 = vld [vmem:[%s3143_s2 + $0x60] sm:$0xff]  ;;  %v471_v36 = vld [vmem:[%s3142_s1 + $0x68] sm:$0xff]  ;;  %vm1232_vm4 = vcmask 130048   ;;  %vm1234_vm5 = vcmask 195584  }
  0x18   : > { %2194 = vmatprep.subr.mxu1 %v2546_v1  ;;  %2230 = vmatprep.mubr.msk.f32.mxu0 %vm2547_vm0, %v2546_v1  ;;  %s264_s28 = scalar_lea.vmem %s3141_s0, %s2065_s16  ;;  %v359_v8 = vld [vmem:[%s3143_s2 + $0x50] sm:$0xff]  ;;  %v358_v9 = vld [vmem:[%s3143_s2 + $0x40] sm:$0xff]  ;;  %v470_v37 = vld [vmem:[%s3142_s1 + $0x38] sm:$0xff]  ;;  %s2550_s16 = smov 112   ;;  %vm1436_vm6 = vcmask 260096  }
  0x19   : > { %2195 = vmatpush3.msra.mxu1 %v268_v2  ;;  %v265_v5 = vld [vmem:[%s264_s28] sm:$0xff]  ;;  %v357_v10 = vld [vmem:[%s3143_s2 + $0x30] sm:$0xff]  ;;  %2223 = vmatpush3.msra.mxu0 %v472_v35  ;;  %v469_v38 = vld [vmem:[%s3142_s1 + $0x8] sm:$0xff]  ;;  %s2808_s28 = scalar_lea.vmem [#allocation7], %s2064_s20  ;;  %s2555_s20 = smov 24  }
  0x1a   : > { %2196 = vmatprep.subr.mxu1 %v2546_v1  ;;  %v356_v11 = vld [vmem:[%s3143_s2 + $0x20] sm:$0xff]  ;;  %v355_v12 = vld [vmem:[%s3143_s2 + $0x10] sm:$0xff]  ;;  %2224 = vmatprep.subr.mxu0 %v2546_v1  ;;  %s2888_s13 = scalar_lea.vmem [#allocation5], %s3149_s10  ;;  %1437 = vst.msk [vmem:[#allocation2] sm:$0x7f] %vm1436_vm6, %v2546_v1  ;;  %s2434_s11 = scalar_lea.vmem %s2433_s9, 256 }
  0x1b   : > { %2197 = vmatpush3.msra.mxu1 %v267_v3  ;;  %v354_v13 = vld [vmem:[%s3143_s2] sm:$0xff]  ;;  %2225 = vmatpush3.msra.mxu0 %v471_v36 }
  0x1c   : > { %2198 = vmatprep.subr.mxu1 %v2546_v1  ;;  %v2066_v14 = vld [vmem:[%s3144_s3] ss:$0 sm:$0xff]  ;;  %v2068_v23 = vld [vmem:[%s3144_s3 + $0x1] ss:$0 sm:$0xff]  ;;  %2226 = vmatprep.subr.mxu0 %v2546_v1  ;;  %v2070_v43 = vld [vmem:[%s3144_s3 + $0x2] ss:$0 sm:$0xff] }
  0x1d   : > { %2199 = vmatpush3.msra.mxu1 %v266_v4  ;;  %2227 = vmatpush3.msra.mxu0 %v470_v37  ;;  %v2071_v45 = vld [vmem:[%s3144_s3 + $0x3] ss:$0 sm:$0xff]  ;;  %v2072_v48 = vld [vmem:[%s3144_s3 + $0x4] ss:$0 sm:$0xff] }
  0x1e   : > { %2201 = vmatmul.mubr.msk.f32.vlgmr.msra.gmra.mxu1 %vm275_vm1, %v265_v5  ;;  %2203 = vmatprep.subr.mxu1 %v2546_v1 }
  0x1f   : > { %2219 = vmatprep.mubr.msk.f32.mxu1 %vm2547_vm0, %v2546_v1  ;;  %2204 = vmatpush3.msra.mxu1 %v361_v6 }
  0x20   : > { %2205 = vmatprep.subr.mxu1 %v2546_v1  ;;  %2228 = vmatprep.subr.mxu0 %v2546_v1 }
  0x21   : > { %2206 = vmatpush3.msra.mxu1 %v360_v7  ;;  %2229 = vmatpush3.msra.mxu0 %v469_v38 }
  0x22   : > { %2207 = vmatprep.subr.mxu1 %v2546_v1  ;;  %2233 = vmatprep.subr.mxu0 %v2546_v1 }
  0x23   : > { %2208 = vmatpush3.msra.mxu1 %v359_v8 }
  0x24   : > { %2209 = vmatprep.subr.mxu1 %v2546_v1 }
  0x25   : > { %2210 = vmatpush3.msra.mxu1 %v358_v9 }
  0x26   : > { %2211 = vmatprep.subr.mxu1 %v2546_v1 }
  0x27   : > { %2212 = vmatpush3.msra.mxu1 %v357_v10 }
  0x28   : > { %2213 = vmatprep.subr.mxu1 %v2546_v1 }
  0x29   : > { %2214 = vmatpush3.msra.mxu1 %v356_v11 }
  0x2a   : > { %2215 = vmatprep.subr.mxu1 %v2546_v1 }
  0x2b   : > { %2216 = vmatpush3.msra.mxu1 %v355_v12 }
  0x2c   : > { %2217 = vmatprep.subr.mxu1 %v2546_v1 }
  0x2d   : > { %2218 = vmatpush3.msra.mxu1 %v354_v13 }
  0x2e   : > { %2238 = vmatprep.subr.mxu1 %v2546_v1 }
  0xde   : > { %v345_v15 = vpop.f32.mrf.mxu1 }
  0xdf   : > { %v346_v16 = vadd.f32 %v2066_v14, %v345_v15 }
  0xe0   : > { %v2202_v17 = vpop.f32.mrf.mxu1 }
  0xe1   : > { %v349_v18 = vmul.f32 0.5, %v346_v16 }
  0xe3   : > { %2396 = vtanh.f32 %v349_v18 }
  0xf0   : > { %v2397_v19 = vpop.eup %2396 }
  0xf1   : > { %v351_v20 = vadd.f32 1.0, %v2397_v19 }
  0xf3   : > { %v352_v21 = vmul.f32 0.5, %v351_v20 }
  0xf5   : > { %v353_v22 = vmul.f32 %v352_v21, %v346_v16 }
  0xf7   : > { %2220 = vmatmul.mubr.msk.f32.vlgmr.msra.gmra.mxu1 %vm367_vm2, %v353_v22 }
  0xf8   : > { %2240 = vmatprep.mubr.msk.f32.mxu1 %vm2547_vm0, %v2546_v1 }
 0x1b7   : > { %v437_v24 = vpop.f32.mrf.mxu1 }
 0x1b8   : > { %v438_v25 = vadd.f32 %v2068_v23, %v437_v24 }
 0x1b9   : > { %v2221_v26 = vpop.f32.mrf.mxu1 }
 0x1ba   : > { %v441_v27 = vmul.f32 0.5, %v438_v25 }
 0x1bc   : > { %v442_v28 = vadd.f32 %v441_v27, %v265_v5 }
 0x1be   : > { %v445_v29 = vsel %vm275_vm1, %v442_v28, 0.0 }
 0x1bf   : > { %446 = vadd.xlane.f32.xlu0 %v445_v29 }
 0x248   : > { %v447_v30 = vpop.xlane.xlu0 %446 }
 0x249   : > { %v449_v31 = vmul.f32 0.03125, %v447_v30 }
 0x24b   : > { %v450_v32 = vsub.f32 %v442_v28, %v449_v31 }
 0x24d   : > { %v451_v33 = vmul.f32 %v450_v32, %v450_v32 }
 0x24f   : > { %v452_v34 = vsel %vm275_vm1, %v451_v33, 0.0 }
 0x250   : > { %453 = vadd.xlane.f32.xlu0 %v452_v34 }
 0x2d9   : > { %v454_v39 = vpop.xlane.xlu0 %453 }
 0x2da   : > { %v455_v40 = vmul.f32 0.03125, %v454_v39 }
 0x2dc   : > { %v456_v41 = vadd.f32 1e-06, %v455_v40 }
 0x2de   : > { %2398 = vrsqrt.f32 %v456_v41 }
 0x2eb   : > { %v2399_v42 = vpop.eup %2398 }
 0x2ec   : > { %v458_v44 = vmul.f32 %v2399_v42, %v450_v32 }
 0x2ee   : > { %v463_v46 = vmul.f32 %v2070_v43, %v458_v44 }
 0x2f0   : > { %v2742_v47 = vadd.f32 %v2071_v45, %v463_v46 }
 0x2f2   : > { %2231 = vmatmul.mubr.msk.f32.vlgmr.msra.gmra.mxu0 %vm275_vm1, %v2742_v47 }
 0x2f3   : > { %2235 = vmatprep.mubr.msk.f32.mxu0 %vm2547_vm0, %v2546_v1 }
 0x3b2   : > { %v547_v49 = vpop.f32.mrf.mxu0 }
 0x3b3   : > { %v548_v50 = vadd.f32 %v2072_v48, %v547_v49 }
 0x3b4   : > { %v2232_v51 = vpop.f32.mrf.mxu0 }
 0x3b5   : > { %556 = vrot.lane.b32.xlu0 %v548_v50, %s2548_s14  ;;  %552 = vrot.lane.b32.xlu1 %v548_v50, %s2549_s15  ;;  %v1239_v51 = vld [vmem:[%s3142_s1 + $0xa0] sm:$0xff]  ;;  %s1890_s14 = sand.u32 1, %s2616_s25   ;;  %s3151_s15 = sshll.u32 %s2616_s25, 7 }
 0x3b6   : > { %s1920_s10 = scalar_lea.hbm %s3146_s5, %s3151_s15 }
 0x3b9   : > { %554 = vrot.lane.b32.xlu1 %v548_v50, %s2550_s16  ;;  %s3150_s16 = smov 8  }
 0x3bd   : > { %558 = vrot.lane.b32.xlu1 %v548_v50, %s2551_s17 }
 0x427   : > { %v2752_v52 = vpop.permute.xlu1 %552  ;;  %v2760_v54 = vpop.permute.xlu0 %556 }
 0x428   : > { %635 = vrot.lane.b32.xlu1 %v2752_v52, %s2551_s17 }
 0x42b   : > { %v2756_v53 = vpop.permute.xlu1 %554 }
 0x42c   : > { %711 = vrot.lane.b32.xlu1 %v2756_v53, %s2551_s17 }
 0x42f   : > { %v559_v55 = vpop.permute.xlu1 %558 }
 0x430   : > { %787 = vrot.lane.b32.xlu1 %v2760_v54, %s2551_s17  ;;  %2234 = vmatpush3.xpose.msk.msra.mxu0 %vm560_vm3, %v559_v55 }
 0x431   : > { %2243 = vmatprep.subr.mxu0 %v2546_v1 }
 0x433   : > { %2236 = vmatmul.mubr.msk.f32.vlgmr.msra.gmra.mxu0 %vm560_vm3, %v548_v50 }
 0x434   : > { %2245 = vmatprep.mubr.msk.f32.mxu0 %vm2547_vm0, %v2546_v1 }
 0x49a   : > { %v636_v56 = vpop.permute.xlu1 %635 }
 0x49b   : > { %2239 = vmatpush3.xpose.msk.msra.mxu1 %vm560_vm3, %v636_v56 }
 0x49c   : > { %2248 = vmatprep.subr.mxu1 %v2546_v1 }
 0x49e   : > { %2241 = vmatmul.mubr.msk.f32.vlgmr.msra.gmra.mxu1 %vm560_vm3, %v2752_v52  ;;  %v712_v57 = vpop.permute.xlu1 %711 }
 0x49f   : > { %2244 = vmatpush3.xpose.msk.msra.mxu0 %vm560_vm3, %v712_v57  ;;  %2250 = vmatprep.mubr.msk.f32.mxu1 %vm2547_vm0, %v2546_v1 }
 0x4a0   : > { %2253 = vmatprep.subr.mxu0 %v2546_v1 }
 0x4a2   : > { %2246 = vmatmul.mubr.msk.f32.vlgmr.msra.gmra.mxu0 %vm560_vm3, %v2756_v53  ;;  %v788_v58 = vpop.permute.xlu1 %787 }
 0x4a3   : > { %2249 = vmatpush3.xpose.msk.msra.mxu1 %vm560_vm3, %v788_v58  ;;  %2255 = vmatprep.mubr.msk.f32.mxu0 %vm2547_vm0, %v2546_v1 }
 0x4a4   : > { %2258 = vmatprep.subr.mxu1 %v2546_v1 }
 0x4a6   : > { %2251 = vmatmul.mubr.msk.f32.vlgmr.msra.gmra.mxu1 %vm560_vm3, %v2760_v54 }
 0x4a7   : > { %2260 = vmatprep.mubr.msk.f32.mxu1 %vm2547_vm0, %v2546_v1 }
 0x4f3   : > { %v631_v59 = vpop.f32.mrf.mxu0 }
 0x4f4   : > { %v863_v60 = vmul.f32 0.35355338, %v631_v59 }
 0x4f5   : > { %v2237_v61 = vpop.f32.mrf.mxu0 }
 0x4f6   : > { %v867_v62 = vsel %vm560_vm3, %v863_v60, -inf }
 0x4f7   : > { %868 = vmax.xlane.f32.xlu1 %v867_v62 }
 0x55e   : > { %v707_v63 = vpop.f32.mrf.mxu1 }
 0x55f   : > { %v864_v0 = vmul.f32 0.35355338, %v707_v63 }
 0x560   : > { %v2242_v2 = vpop.f32.mrf.mxu1 }
 0x561   : > { %v870_v3 = vsel %vm560_vm3, %v864_v0, -inf }
 0x562   : > { %v783_v4 = vpop.f32.mrf.mxu0  ;;  %871 = vmax.xlane.f32.xlu0 %v870_v3 }
 0x563   : > { %v865_v5 = vmul.f32 0.35355338, %v783_v4  ;;  %v2086_v4 = vld [vmem:[%s3144_s3 + $0x5] ss:$0 sm:$0xff] }
 0x564   : > { %v2247_v6 = vpop.f32.mrf.mxu0 }
 0x565   : > { %v873_v7 = vsel %vm560_vm3, %v865_v5, -inf }
 0x566   : > { %874 = vmax.xlane.f32.xlu1 %v873_v7  ;;  %v859_v8 = vpop.f32.mrf.mxu1 }
 0x567   : > { %v866_v9 = vmul.f32 0.35355338, %v859_v8 }
 0x568   : > { %v2252_v10 = vpop.f32.mrf.mxu1 }
 0x569   : > { %v876_v11 = vsel %vm560_vm3, %v866_v9, -inf }
 0x56a   : > { %877 = vmax.xlane.f32.xlu0 %v876_v11 }
 0x577   : > { %915 = vrot.lane.b32.xlu1 %v548_v50, %s2552_s18 }
 0x580   : > { %v869_v12 = vpop.xlane.xlu1 %868 }
 0x581   : > { %v879_v13 = vsub.f32 %v863_v60, %v869_v12 }
 0x583   : > { %v883_v14 = vmul.f32 1.442695, %v879_v13 }
 0x585   : > { %2400 = vpow2.f32 %v883_v14 }
 0x592   : > { %v2401_v15 = vpop.eup %2400 }
 0x593   : > { %v891_v16 = vsel %vm560_vm3, %v2401_v15, 0.0 }
 0x59b   : > { %892 = vadd.xlane.f32.xlu1 %v891_v16  ;;  %v1347_v16 = vld [vmem:[%s3142_s1 + $0x78] sm:$0xff] }
 0x5eb   : > { %v872_v17 = vpop.xlane.xlu0 %871 }
 0x5ec   : > { %v880_v18 = vsub.f32 %v864_v0, %v872_v17  ;;  %v1345_v17 = vld [vmem:[%s3142_s1 + $0x18] sm:$0xff] }
 0x5ee   : > { %v885_v19 = vmul.f32 1.442695, %v880_v18 }
 0x5ef   : > { %v875_v20 = vpop.xlane.xlu1 %874 }
 0x5f0   : > { %2402 = vpow2.f32 %v885_v19  ;;  %v881_v21 = vsub.f32 %v865_v5, %v875_v20 }
 0x5f2   : > { %v887_v22 = vmul.f32 1.442695, %v881_v21 }
 0x5f3   : > { %v916_v23 = vpop.permute.xlu1 %915  ;;  %v878_v24 = vpop.xlane.xlu0 %877 }
 0x5f4   : > { %2404 = vpow2.f32 %v887_v22  ;;  %v882_v25 = vsub.f32 %v866_v9, %v878_v24  ;;  %2254 = vmatpush3.msra.mxu0 %v916_v23  ;;  %v2088_v22 = vld [vmem:[%s3144_s3 + $0x6] ss:$0 sm:$0xff]  ;;  %v2089_v24 = vld [vmem:[%s3144_s3 + $0x7] ss:$0 sm:$0xff] }
 0x5f5   : > { %2263 = vmatprep.subr.mxu0 %v2546_v1 }
 0x5f6   : > { %v889_v26 = vmul.f32 1.442695, %v882_v25 }
 0x5f8   : > { %2406 = vpow2.f32 %v889_v26 }
 0x5fd   : > { %v2403_v27 = vpop.eup %2402 }
 0x5fe   : > { %v894_v28 = vsel %vm560_vm3, %v2403_v27, 0.0 }
 0x5ff   : > { %895 = vadd.xlane.f32.xlu0 %v894_v28 }
 0x601   : > { %v2405_v29 = vpop.eup %2404 }
 0x602   : > { %v897_v30 = vsel %vm560_vm3, %v2405_v29, 0.0 }
 0x603   : > { %898 = vadd.xlane.f32.xlu1 %v897_v30 }
 0x605   : > { %v2407_v31 = vpop.eup %2406 }
 0x606   : > { %v900_v32 = vsel %vm560_vm3, %v2407_v31, 0.0 }
 0x607   : > { %901 = vadd.xlane.f32.xlu0 %v900_v32  ;;  %v1579_v32 = vld [vmem:[%s3142_s1 + $0xb0] sm:$0xff] }
 0x614   : > { %1067 = vrot.lane.b32.xlu1 %v2756_v53, %s2552_s18  ;;  %v1237_v53 = vld [vmem:[%s3142_s1 + $0x40] sm:$0xff] }
 0x618   : > { %1143 = vrot.lane.b32.xlu1 %v2760_v54, %s2552_s18  ;;  %v1236_v54 = vld [vmem:[%s3142_s1 + $0x10] sm:$0xff] }
 0x61d   : > { %991 = vrot.lane.b32.xlu0 %v2752_v52, %s2552_s18  ;;  %v1238_v52 = vld [vmem:[%s3142_s1 + $0x70] sm:$0xff]  ;;  %s2554_s18 = smov 16  }
 0x624   : > { %v893_v33 = vpop.xlane.xlu1 %892 }
 0x625   : > { %2408 = vrcp.f32 %v893_v33  ;;  %v1578_v33 = vld [vmem:[%s3142_s1 + $0x80] sm:$0xff] }
 0x632   : > { %v2409_v34 = vpop.eup %2408 }
 0x633   : > { %v904_v35 = vmul.f32 %v2409_v34, %v2401_v15  ;;  %v1348_v15 = vld [vmem:[%s3142_s1 + $0xa8] sm:$0xff]  ;;  %v1577_v34 = vld [vmem:[%s3142_s1 + $0x50] sm:$0xff] }
 0x635   : > { %2256 = vmatmul.mubr.msk.f32.vlgmr.msra.gmra.mxu0 %vm560_vm3, %v904_v35  ;;  %911 = vst.msk [vmem:[%s2808_s28] sm:$0xff] %vm560_vm3, %v904_v35  ;;  %v1576_v35 = vld [vmem:[%s3142_s1 + $0x20] sm:$0xff] }
 0x636   : > { %2265 = vmatprep.mubr.msk.f32.mxu0 %vm2547_vm0, %v2546_v1 }
 0x688   : > { %v896_v36 = vpop.xlane.xlu0 %895 }
 0x689   : > { %2410 = vrcp.f32 %v896_v36 }
 0x68c   : > { %v899_v37 = vpop.xlane.xlu1 %898 }
 0x68d   : > { %2412 = vrcp.f32 %v899_v37 }
 0x690   : > { %v1068_v38 = vpop.permute.xlu1 %1067  ;;  %v902_v39 = vpop.xlane.xlu0 %901 }
 0x691   : > { %2414 = vrcp.f32 %v902_v39  ;;  %2264 = vmatpush3.msra.mxu0 %v1068_v38 }
 0x692   : > { %2273 = vmatprep.subr.mxu0 %v2546_v1 }
 0x694   : > { %v992_v40 = vpop.permute.xlu0 %991  ;;  %v1144_v43 = vpop.permute.xlu1 %1143 }
 0x695   : > { %2259 = vmatpush3.msra.mxu1 %v992_v40 }
 0x696   : > { %v2411_v41 = vpop.eup %2410  ;;  %2268 = vmatprep.subr.mxu1 %v2546_v1 }
 0x697   : > { %v906_v42 = vmul.f32 %v2411_v41, %v2403_v27  ;;  %v2090_v27 = vld [vmem:[%s3144_s3 + $0x8] ss:$0 sm:$0xff]  ;;  %v2092_v41 = vld [vmem:[%s3144_s3 + $0x11] ss:$0 sm:$0xff] }
 0x699   : > { %2261 = vmatmul.mubr.msk.f32.vlgmr.msra.gmra.mxu1 %vm560_vm3, %v906_v42  ;;  %912 = vst.msk [vmem:[%s2808_s28 + $0x8] sm:$0xff] %vm560_vm3, %v906_v42  ;;  %v2093_v42 = vld [vmem:[%s3144_s3 + $0x12] ss:$0 sm:$0xff] }
 0x69a   : > { %v2413_v44 = vpop.eup %2412  ;;  %2269 = vmatpush3.msra.mxu1 %v1144_v43  ;;  %2270 = vmatprep.mubr.msk.f32.mxu1 %vm2547_vm0, %v2546_v1  ;;  %v2094_v43 = vld [vmem:[%s3144_s3 + $0x13] ss:$0 sm:$0xff] }
 0x69b   : > { %v908_v45 = vmul.f32 %v2413_v44, %v2405_v29  ;;  %2284 = vmatprep.subr.mxu1 %v2546_v1  ;;  %v2095_v44 = vld [vmem:[%s3144_s3 + $0x14] ss:$0 sm:$0xff] }
 0x69d   : > { %2266 = vmatmul.mubr.msk.f32.vlgmr.msra.gmra.mxu0 %vm560_vm3, %v908_v45  ;;  %913 = vst.msk [vmem:[%s2808_s28 + $0x10] sm:$0xff] %vm560_vm3, %v908_v45  ;;  %v2096_v45 = vld [vmem:[%s3144_s3 + $0x15] ss:$0 sm:$0xff] }
 0x69e   : > { %v2415_v46 = vpop.eup %2414  ;;  %2281 = vmatprep.mubr.msk.f32.mxu0 %vm2547_vm0, %v2546_v1  ;;  %2274 = vmatpush3.msra.mxu0 %v1239_v51  ;;  %v2101_v51 = vld [vmem:[%s3144_s3 + $0x1a] ss:$0 sm:$0xff] }
 0x69f   : > { %v910_v48 = vmul.f32 %v2415_v46, %v2407_v31  ;;  %2275 = vmatprep.subr.mxu0 %v2546_v1  ;;  %v2097_v46 = vld [vmem:[%s3144_s3 + $0x16] ss:$0 sm:$0xff] }
 0x6a0   : > { %2276 = vmatpush3.msra.mxu0 %v1238_v52 }
 0x6a1   : > { %2271 = vmatmul.mubr.msk.f32.vlgmr.msra.gmra.mxu1 %vm560_vm3, %v910_v48  ;;  %914 = vst.msk [vmem:[%s2808_s28 + $0x18] sm:$0xff] %vm560_vm3, %v910_v48  ;;  %2277 = vmatprep.subr.mxu0 %v2546_v1  ;;  %v2098_v48 = vld [vmem:[%s3144_s3 + $0x17] ss:$0 sm:$0xff] }
 0x6a2   : > { %2292 = vmatprep.mubr.msk.f32.mxu1 %vm2547_vm0, %v2546_v1  ;;  %2278 = vmatpush3.msra.mxu0 %v1237_v53 }
 0x6a3   : > { %2279 = vmatprep.subr.mxu0 %v2546_v1  ;;  %2285 = vmatpush3.msra.mxu1 %v1348_v15 }
 0x6a4   : > { %2280 = vmatpush3.msra.mxu0 %v1236_v54  ;;  %2286 = vmatprep.subr.mxu1 %v2546_v1 }
 0x6a5   : > { %2295 = vmatprep.subr.mxu0 %v2546_v1  ;;  %2287 = vmatpush3.msra.mxu1 %v1347_v16 }
 0x6a6   : > { %2288 = vmatprep.subr.mxu1 %v2546_v1 }
 0x6f5   : > { %v987_v49 = vpop.f32.mrf.mxu0 }
 0x6f7   : > { %v2257_v50 = vpop.f32.mrf.mxu0 }
 0x6f8   : > { %v2100_v50 = vld [vmem:[%s3144_s3 + $0x19] ss:$0 sm:$0xff] }
 0x759   : > { %v1063_v55 = vpop.f32.mrf.mxu1 }
 0x75a   : > { %1220 = vrot.lane.b32.xlu0 %v1063_v55, %s3150_s16  ;;  %v2102_v55 = vld [vmem:[%s3144_s3 + $0x1b] ss:$0 sm:$0xff] }
 0x75b   : > { %v2262_v56 = vpop.f32.mrf.mxu1 }
 0x75d   : > { %v1139_v57 = vpop.f32.mrf.mxu0 }
 0x75e   : > { %1224 = vrot.lane.b32.xlu1 %v1139_v57, %s2554_s18  ;;  %s3048_s18 = scalar_lea.sflag [#allocation6], %s1890_s14 }
 0x75f   : > { %v2267_v58 = vpop.f32.mrf.mxu0 }
 0x761   : > { %v1215_v59 = vpop.f32.mrf.mxu1 }
 0x762   : > { %1228 = vrot.lane.b32.xlu0 %v1215_v59, %s2555_s20 }
 0x763   : > { %v2272_v60 = vpop.f32.mrf.mxu1 }
 0x7cc   : > { %v1221_v61 = vpop.permute.xlu0 %1220 }
 0x7cd   : > { %v1231_v63 = vsel %vm560_vm3, %v987_v49, %v1221_v61  ;;  %v2099_v49 = vld [vmem:[%s3144_s3 + $0x18] ss:$0 sm:$0xff] }
 0x7d0   : > { %v1225_v62 = vpop.permute.xlu1 %1224 }
 0x7d1   : > { %v1233_v0 = vsel %vm1232_vm4, %v1231_v63, %v1225_v62  ;;  %v2104_v62 = vld [vmem:[%s3144_s3 + $0x1d] ss:$0 sm:$0xff]  ;;  %v2105_v63 = vld [vmem:[%s3144_s3 + $0x1e] ss:$0 sm:$0xff] }
 0x7d4   : > { %v1229_v2 = vpop.permute.xlu0 %1228 }
 0x7d5   : > { %v1235_v3 = vsel %vm1234_vm5, %v1233_v0, %v1229_v2 }
 0x7d6   : > { %2282 = vmatmul.mubr.msk.f32.vlgmr.msra.gmra.mxu0 %vm275_vm1, %v1235_v3 }
 0x7d7   : > { %2303 = vmatprep.mubr.msk.f32.mxu0 %vm2547_vm0, %v2546_v1  ;;  %2296 = vmatpush3.msra.mxu0 %v1579_v32 }
 0x7d8   : > { %2297 = vmatprep.subr.mxu0 %v2546_v1 }
 0x7d9   : > { %2298 = vmatpush3.msra.mxu0 %v1578_v33 }
 0x7da   : > { %2299 = vmatprep.subr.mxu0 %v2546_v1 }
 0x7db   : > { %2300 = vmatpush3.msra.mxu0 %v1577_v34 }
 0x7dc   : > { %2301 = vmatprep.subr.mxu0 %v2546_v1 }
 0x7dd   : > { %2302 = vmatpush3.msra.mxu0 %v1576_v35 }
 0x7de   : > { %2317 = vmatprep.subr.mxu0 %v2546_v1 }
 0x896   : > { %v1314_v5 = vpop.f32.mrf.mxu0 }
 0x897   : > { %v1315_v6 = vadd.f32 %v2086_v4, %v1314_v5 }
 0x898   : > { %v2283_v7 = vpop.f32.mrf.mxu0 }
 0x899   : > { %v1318_v8 = vadd.f32 %v1315_v6, %v2742_v47  ;;  %v1346_v47 = vld [vmem:[%s3142_s1 + $0x48] sm:$0xff]  ;;  %v2103_v7 = vld [vmem:[%s3144_s3 + $0x1c] ss:$0 sm:$0xff] }
 0x89a   : > { %2289 = vmatpush3.msra.mxu1 %v1346_v47 }
 0x89b   : > { %v1321_v9 = vsel %vm275_vm1, %v1318_v8, 0.0  ;;  %2290 = vmatprep.subr.mxu1 %v2546_v1 }
 0x89c   : > { %1322 = vadd.xlane.f32.xlu1 %v1321_v9  ;;  %2291 = vmatpush3.msra.mxu1 %v1345_v17 }
 0x89d   : > { %2306 = vmatprep.subr.mxu1 %v2546_v1 }
 0x925   : > { %v1323_v10 = vpop.xlane.xlu1 %1322 }
 0x926   : > { %v1324_v11 = vmul.f32 0.03125, %v1323_v10 }
 0x928   : > { %v1325_v12 = vsub.f32 %v1318_v8, %v1324_v11  ;;  %v2106_v8 = vld [vmem:[%s3144_s3 + $0x1f] ss:$0 sm:$0xff] }
 0x92a   : > { %v1326_v13 = vmul.f32 %v1325_v12, %v1325_v12 }
 0x92c   : > { %v1327_v14 = vsel %vm275_vm1, %v1326_v13, 0.0 }
 0x92d   : > { %1328 = vadd.xlane.f32.xlu0 %v1327_v14 }
 0x9b6   : > { %v1329_v18 = vpop.xlane.xlu0 %1328 }
 0x9b7   : > { %v1330_v19 = vmul.f32 0.03125, %v1329_v18 }
 0x9b9   : > { %v1331_v20 = vadd.f32 1e-06, %v1330_v19 }
 0x9bb   : > { %2416 = vrsqrt.f32 %v1331_v20 }
 0x9c8   : > { %v2417_v21 = vpop.eup %2416 }
 0x9c9   : > { %v1333_v23 = vmul.f32 %v2417_v21, %v1325_v12 }
 0x9cb   : > { %v1338_v25 = vmul.f32 %v2088_v22, %v1333_v23 }
 0x9cd   : > { %v2882_v26 = vadd.f32 %v2089_v24, %v1338_v25 }
 0x9cf   : > { %2293 = vmatmul.mubr.msk.f32.vlgmr.msra.gmra.mxu1 %vm275_vm1, %v2882_v26  ;;  %1344 = vst.msk [vmem:[%s2888_s13] sm:$0xff] %vm275_vm1, %v2882_v26 }
 0x9d0   : > { %2314 = vmatprep.mubr.msk.f32.mxu1 %vm2547_vm0, %v2546_v1 }
 0xa8f   : > { %v1423_v28 = vpop.f32.mrf.mxu1 }
 0xa90   : > { %v1424_v29 = vadd.f32 %v2090_v27, %v1423_v28 }
 0xa91   : > { %v2294_v30 = vpop.f32.mrf.mxu1 }
 0xa92   : > { %v1427_v31 = vmul.f32 0.5, %v1424_v29 }
 0xa94   : > { %2418 = vtanh.f32 %v1427_v31 }
 0xaa1   : > { %v2419_v36 = vpop.eup %2418 }
 0xaa2   : > { %v1429_v37 = vadd.f32 1.0, %v2419_v36 }
 0xaa4   : > { %v1430_v38 = vmul.f32 0.5, %v1429_v37  ;;  %v2107_v37 = vld [vmem:[%s3144_s3 + $0x9] ss:$0 sm:$0xff] }
 0xaa6   : > { %1432 = vrot.lane.b32.xlu0 %v1430_v38, %s2551_s17  ;;  %s1922_s17 = sshll.u32 %s2888_s13, 4  ;;  %s1923_s17 = int_to_ptr.vmem [resolvable:$true] %s1922_s17 }
 0xaa7   : > { %s2428_s20 = scalar_lea.vmem %s1923_s17, 128  ;;  %p2435_p0 = scmp.lt.s32.totalorder %s1923_s17, %s2433_s9 }
 0xaa8   : > { %p2429_p11 = scmp.ne.s32.totalorder %s1923_s17, %s2428_s20  ;;  %p2436_p1 = scmp.lt.s32.totalorder %s2434_s11, %s2428_s20 }
 0xaaa   : > { %p2430_p12 = pnand %p2429_p11, %p2635_p5  ;;  %p2437_p2 = por %p2436_p1, %p2435_p0 }
 0xaac   : > { %p2431_p13 = pneg %p2430_p12 }
 0xaae   : > { %p2438_p3 = pnand %p2437_p2, %p2431_p13 }
 0xb18   : > { %v1433_v39 = vpop.permute.xlu0 %1432 }
 0xb19   : > { %v1435_v40 = vmul.f32 %v1433_v39, %v1424_v29 }
 0xb1b   : > { %1441 = vst.msk [vmem:[#allocation2 + $0x7] sm:$0xff] %vm275_vm1, %v1435_v40 }
 0xb22   : > { %v1442_v52 = vld [vmem:[#allocation2] sm:$0xff]  ;;  %v1506_v6 = vld [vmem:[#allocation2 + $0x8] sm:$0xff] }
 0xb23   : > { %v1450_v53 = vld [vmem:[#allocation2 + $0x1] sm:$0xff]  ;;  %v1448_v56 = vmul.f32 %v2092_v41, %v1442_v52  ;;  %v1514_v11 = vld [vmem:[#allocation2 + $0x9] sm:$0xff]  ;;  %v1512_v16 = vmul.f32 %v2100_v50, %v1506_v6  ;;  %v1778_v6 = vld [vmem:[%s3143_s2 + $0x78] sm:$0xff] }
 0xb24   : > { %v1458_v54 = vld [vmem:[#allocation2 + $0x2] sm:$0xff]  ;;  %v1456_v57 = vmul.f32 %v2093_v42, %v1450_v53  ;;  %v1522_v12 = vld [vmem:[#allocation2 + $0xa] sm:$0xff]  ;;  %v1520_v47 = vmul.f32 %v2101_v51, %v1514_v11 }
 0xb25   : > { %v1464_v58 = vmul.f32 %v2094_v43, %v1458_v54  ;;  %v1466_v59 = vld [vmem:[#allocation2 + $0x3] sm:$0xff]  ;;  %v1530_v13 = vld [vmem:[#allocation2 + $0xb] sm:$0xff]  ;;  %v1528_v22 = vmul.f32 %v2102_v55, %v1522_v12  ;;  %v1772_v12 = vld [vmem:[%s3143_s2 + $0x18] sm:$0xff] }
 0xb26   : > { %v1474_v60 = vld [vmem:[#allocation2 + $0x4] sm:$0xff]  ;;  %v1472_v0 = vmul.f32 %v2095_v44, %v1466_v59  ;;  %v1538_v17 = vld [vmem:[#allocation2 + $0xc] sm:$0xff]  ;;  %v1536_v29 = vmul.f32 %v2103_v7, %v1530_v13 }
 0xb27   : > { %v1482_v61 = vld [vmem:[#allocation2 + $0x5] sm:$0xff]  ;;  %v1480_v2 = vmul.f32 %v2096_v45, %v1474_v60  ;;  %v1546_v18 = vld [vmem:[#allocation2 + $0xd] sm:$0xff]  ;;  %v1544_v25 = vmul.f32 %v2104_v62, %v1538_v17 }
 0xb28   : > { %v1488_v3 = vmul.f32 %v2097_v46, %v1482_v61  ;;  %v1490_v4 = vld [vmem:[#allocation2 + $0x6] sm:$0xff]  ;;  %v1554_v19 = vld [vmem:[#allocation2 + $0xe] sm:$0xff]  ;;  %v1552_v27 = vmul.f32 %v2105_v63, %v1546_v18 }
 0xb29   : > { %v1498_v5 = vld [vmem:[#allocation2 + $0x7] sm:$0xff]  ;;  %v1496_v9 = vmul.f32 %v2098_v48, %v1490_v4  ;;  %v1481_v14 = vadd.f32 %v1480_v2, %v1448_v56  ;;  %v1560_v30 = vmul.f32 %v2106_v8, %v1554_v19  ;;  %v1776_v8 = vld [vmem:[%s3143_s2 + $0x58] sm:$0xff] }
 0xb2a   : > { %v1504_v10 = vmul.f32 %v2099_v49, %v1498_v5  ;;  %v1489_v15 = vadd.f32 %v1488_v3, %v1456_v57  ;;  %v2108_v45 = vld [vmem:[%s3144_s3 + $0xa] ss:$0 sm:$0xff]  ;;  %v1687_v57 = vld [vmem:[%s3142_s1 + $0xb8] sm:$0xff]  ;;  %v2111_v3 = vld [vmem:[%s3144_s3 + $0xc] ss:$0 sm:$0xff] }
 0xb2b   : > { %v1497_v20 = vadd.f32 %v1496_v9, %v1464_v58  ;;  %v1513_v23 = vadd.f32 %v1512_v16, %v1481_v14  ;;  %v1686_v58 = vld [vmem:[%s3142_s1 + $0x88] sm:$0xff]  ;;  %2307 = vmatpush3.msra.mxu1 %v1687_v57 }
 0xb2c   : > { %v1505_v21 = vadd.f32 %v1504_v10, %v1472_v0  ;;  %v1521_v24 = vadd.f32 %v1520_v47, %v1489_v15  ;;  %2308 = vmatprep.subr.mxu1 %v2546_v1  ;;  %v1684_v59 = vld [vmem:[%s3142_s1 + $0x28] sm:$0xff]  ;;  %v1774_v10 = vld [vmem:[%s3143_s2 + $0x38] sm:$0xff] }
 0xb2d   : > { %v1529_v28 = vadd.f32 %v1528_v22, %v1497_v20  ;;  %v1545_v31 = vadd.f32 %v1544_v25, %v1513_v23  ;;  %2309 = vmatpush3.msra.mxu1 %v1686_v58  ;;  %v2110_v0 = vld [vmem:[%s3144_s3 + $0xb] ss:$0 sm:$0xff]  ;;  %v2112_v14 = vld [vmem:[%s3144_s3 + $0xd] ss:$0 sm:$0xff] }
 0xb2e   : > { %v1553_v32 = vadd.f32 %v1552_v27, %v1521_v24  ;;  %v1537_v33 = vadd.f32 %v1536_v29, %v1505_v21  ;;  %2310 = vmatprep.subr.mxu1 %v2546_v1  ;;  %v1777_v7 = vld [vmem:[%s3143_s2 + $0x68] sm:$0xff] }
 0xb2f   : > { %v1561_v34 = vadd.f32 %v1560_v30, %v1529_v28  ;;  %v1775_v9 = vld [vmem:[%s3143_s2 + $0x48] sm:$0xff] }
 0xb30   : > { %v1562_v35 = vadd.f32 %v1553_v32, %v1545_v31  ;;  %v1773_v11 = vld [vmem:[%s3143_s2 + $0x28] sm:$0xff] }
 0xb31   : > { %v1563_v36 = vadd.f32 %v1561_v34, %v1537_v33  ;;  %v1771_v13 = vld [vmem:[%s3143_s2 + $0x8] sm:$0xff] }
 0xb33   : > { %v1564_v38 = vadd.f32 %v1563_v36, %v1562_v35 }
 0xb35   : > { %v1570_v39 = vadd.f32 %v2107_v37, %v1564_v38 }
 0xb37   : > { %v1571_v40 = vmul.f32 0.5, %v1570_v39 }
 0xb39   : > { %2420 = vtanh.f32 %v1571_v40 }
 0xb46   : > { %v2421_v41 = vpop.eup %2420 }
 0xb47   : > { %v1573_v42 = vadd.f32 1.0, %v2421_v41 }
 0xb49   : > { %v1574_v43 = vmul.f32 0.5, %v1573_v42 }
 0xb4b   : > { %v1575_v44 = vmul.f32 %v1574_v43, %v1570_v39 }
 0xb4d   : > { %2304 = vmatmul.mubr.msk.f32.vlgmr.msra.gmra.mxu0 %vm275_vm1, %v1575_v44 }
 0xb4e   : > { %2333 = vmatprep.mubr.msk.f32.mxu0 %vm2547_vm0, %v2546_v1  ;;  %2318 = vmatpush3.msra.mxu0 %v1778_v6 }
 0xb4f   : > { %2319 = vmatprep.subr.mxu0 %v2546_v1 }
 0xb50   : > { %2320 = vmatpush3.msra.mxu0 %v1777_v7 }
 0xb51   : > { %2321 = vmatprep.subr.mxu0 %v2546_v1 }
 0xb52   : > { %2322 = vmatpush3.msra.mxu0 %v1776_v8 }
 0xb53   : > { %2323 = vmatprep.subr.mxu0 %v2546_v1 }
 0xb54   : > { %2324 = vmatpush3.msra.mxu0 %v1775_v9 }
 0xb55   : > { %2325 = vmatprep.subr.mxu0 %v2546_v1 }
 0xb56   : > { %2326 = vmatpush3.msra.mxu0 %v1774_v10 }
 0xb57   : > { %2327 = vmatprep.subr.mxu0 %v2546_v1 }
 0xb58   : > { %2328 = vmatpush3.msra.mxu0 %v1773_v11 }
 0xb59   : > { %2329 = vmatprep.subr.mxu0 %v2546_v1 }
 0xb5a   : > { %2330 = vmatpush3.msra.mxu0 %v1772_v12 }
 0xb5b   : > { %2331 = vmatprep.subr.mxu0 %v2546_v1 }
 0xb5c   : > { %2332 = vmatpush3.msra.mxu0 %v1771_v13 }
 0xc0d   : > { %v1654_v46 = vpop.f32.mrf.mxu0 }
 0xc0e   : > { %v1655_v48 = vadd.f32 %v2108_v45, %v1654_v46 }
 0xc0f   : > { %v2305_v49 = vpop.f32.mrf.mxu0 }
 0xc10   : > { %v1658_v50 = vadd.f32 %v1655_v48, %v2882_v26  ;;  %v1685_v26 = vld [vmem:[%s3142_s1 + $0x58] sm:$0xff] }
 0xc11   : > { %2311 = vmatpush3.msra.mxu1 %v1685_v26 }
 0xc12   : > { %v1661_v51 = vsel %vm275_vm1, %v1658_v50, 0.0  ;;  %2312 = vmatprep.subr.mxu1 %v2546_v1  ;;  %v2114_v1 = vld [vmem:[%s3144_s3 + $0xe] ss:$0 sm:$0xff] }
 0xc13   : > { %1662 = vadd.xlane.f32.xlu1 %v1661_v51  ;;  %2313 = vmatpush3.msra.mxu1 %v1684_v59 }
 0xc9c   : > { %v1663_v52 = vpop.xlane.xlu1 %1662 }
 0xc9d   : > { %v1664_v53 = vmul.f32 0.03125, %v1663_v52 }
 0xc9f   : > { %v1665_v54 = vsub.f32 %v1658_v50, %v1664_v53 }
 0xca1   : > { %v1666_v55 = vmul.f32 %v1665_v54, %v1665_v54 }
 0xca3   : > { %v1667_v56 = vsel %vm275_vm1, %v1666_v55, 0.0 }
 0xca4   : > { %1668 = vadd.xlane.f32.xlu1 %v1667_v56 }
 0xd2d   : > { %v1669_v60 = vpop.xlane.xlu1 %1668 }
 0xd2e   : > { %v1670_v61 = vmul.f32 0.03125, %v1669_v60 }
 0xd30   : > { %v1671_v62 = vadd.f32 1e-06, %v1670_v61 }
 0xd32   : > { %2422 = vrsqrt.f32 %v1671_v62 }
 0xd3f   : > { %v2423_v63 = vpop.eup %2422 }
 0xd40   : > { %v1673_v2 = vmul.f32 %v2423_v63, %v1665_v54 }
 0xd42   : > { %v1678_v4 = vmul.f32 %v2110_v0, %v1673_v2 }
 0xd44   : > { %v1683_v5 = vadd.f32 %v2111_v3, %v1678_v4 }
 0xd46   : > { %2315 = vmatmul.mubr.msk.f32.vlgmr.msra.gmra.mxu1 %vm275_vm1, %v1683_v5 }
 0xe06   : > { %v1762_v15 = vpop.f32.mrf.mxu1 }
 0xe07   : > { %v1763_v16 = vadd.f32 %v2112_v14, %v1762_v15 }
 0xe08   : > { %v2316_v47 = vpop.f32.mrf.mxu1 }
 0xe09   : > { %v1766_v17 = vmul.f32 0.5, %v1763_v16 }
 0xe0b   : > { %2424 = vtanh.f32 %v1766_v17 }
 0xe18   : > { %v2425_v18 = vpop.eup %2424 }
 0xe19   : > { %v1768_v19 = vadd.f32 1.0, %v2425_v18 }
 0xe1b   : > { %v1769_v20 = vmul.f32 0.5, %v1768_v19 }
 0xe1d   : > { %v1770_v21 = vmul.f32 %v1769_v20, %v1763_v16 }
 0xe1f   : > { %2334 = vmatmul.mubr.msk.f32.vlgmr.msra.gmra.mxu0 %vm367_vm2, %v1770_v21 }
 0xedf   : > { %v1853_v22 = vpop.f32.mrf.mxu0 }
 0xee0   : > { %v1854_v23 = vadd.f32 %v2114_v1, %v1853_v22 }
 0xee1   : > { %v2335_v24 = vpop.f32.mrf.mxu0 }
 0xee2   : > { %v1857_v25 = vmul.f32 0.5, %v1854_v23 }
 0xee4   : > { %v1858_v27 = vadd.f32 %v1857_v25, %v1683_v5 }
 0xee6   : > { %v1861_v28 = vsel %vm275_vm1, %v1858_v27, 0.0 }
 0xee7   : > { %1862 = vadd.xlane.f32.xlu1 %v1861_v28 }
 0xf70   : > { %v1863_v29 = vpop.xlane.xlu1 %1862 }
 0xf71   : > { %v1864_v30 = vmul.f32 0.03125, %v1863_v29 }
 0xf73   : > { %v3035_v31 = vsub.f32 %v1858_v27, %v1864_v30 }
 0xf75   : > { %v1866_v32 = vmul.f32 %v3035_v31, %v3035_v31 }
 0xf77   : > { %v1867_v33 = vsel %vm275_vm1, %v1866_v32, 0.0 }
 0xf78   : > { %1868 = vadd.xlane.f32.xlu1 %v1867_v33 }
 0xf79   : > { %2441 = shalt.err (!%p2438_p3)
}
 0xf7a   : > { %s2442_s12 = scalar_lea.hbm %s1920_s10, 128  ;;  %s2446_s26 = scalar_lea.hbm %s3146_s5, 256 }
 0xf7b   : > { %p2443_p4 = scmp.ne.s32.totalorder %s1920_s10, %s2442_s12  ;;  %p2447_p9 = scmp.lt.s32.totalorder %s1920_s10, %s3146_s5 }
 0xf7c   : > { %p2448_p10 = scmp.lt.s32.totalorder %s2446_s26, %s2442_s12 }
 0xf7d   : > { %p2444_p7 = pnand %p2443_p4, %p2635_p5 }
 0xf7e   : > { %p2449_p11 = por %p2448_p10, %p2447_p9 }
 0xf7f   : > { %p2445_p8 = pneg %p2444_p7 }
 0xf81   : > { %p2450_p12 = pnand %p2449_p11, %p2445_p8 }
 0xf83   : > { %2453 = shalt.err (!%p2450_p12)
}
 0xf84   : > { %2337 = dma.vmem_to_hbm [thread:$0]  (%p2635_p5), %s1923_s17, 128, %s1920_s10, %s3048_s18  }
 0xf85   : > { %s1935_s20 = sshll.u32 %s2808_s28, 4  ;;  %s2127_s29 = sshll.u32 %s2616_s25, 9  ;;  %s3064_s20 = int_to_ptr.vmem [resolvable:$true] %s1935_s20 }
 0xf86   : > { %s3070_s11 = scalar_lea.hbm %s3147_s6, %s2127_s29  ;;  %s2454_s12 = scalar_lea.vmem %s3064_s20, 512 }
 0xf87   : > { %p2455_p13 = scmp.ne.s32.totalorder %s3064_s20, %s2454_s12  ;;  %s2557_s13 = smov [#allocation7]  }
 0xf88   : > { %s2458_s14 = sshll.u32 %s2557_s13, 4  ;;  %s2459_s14 = int_to_ptr.vmem [resolvable:$false] %s2458_s14 }
 0xf89   : > { %p2456_p0 = pnand %p2455_p13, %p2635_p5  ;;  %s2460_s28 = scalar_lea.vmem %s2459_s14, 1024 }
 0xf8a   : > { %p2461_p2 = scmp.lt.s32.totalorder %s3064_s20, %s2459_s14  ;;  %p2462_p3 = scmp.lt.s32.totalorder %s2460_s28, %s2454_s12 }
 0xf8b   : > { %p2457_p1 = pneg %p2456_p0 }
 0xf8c   : > { %p2463_p4 = por %p2462_p3, %p2461_p2 }
 0xf8e   : > { %p2464_p7 = pnand %p2463_p4, %p2457_p1 }
 0xf90   : > { %2467 = shalt.err (!%p2464_p7)
}
 0xf91   : > { %s2468_s10 = scalar_lea.hbm %s3070_s11, 512  ;;  %s2472_s16 = scalar_lea.hbm %s3147_s6, 1024 }
 0xf92   : > { %p2469_p8 = scmp.ne.s32.totalorder %s3070_s11, %s2468_s10  ;;  %p2473_p11 = scmp.lt.s32.totalorder %s3070_s11, %s3147_s6 }
 0xf93   : > { %p2474_p12 = scmp.lt.s32.totalorder %s2472_s16, %s2468_s10 }
 0xf94   : > { %p2470_p9 = pnand %p2469_p8, %p2635_p5 }
 0xf95   : > { %p2475_p13 = por %p2474_p12, %p2473_p11 }
 0xf96   : > { %p2471_p10 = pneg %p2470_p9 }
 0xf98   : > { %p2476_p0 = pnand %p2475_p13, %p2471_p10 }
 0xf9a   : > { %2479 = shalt.err (!%p2476_p0)
}
 0xf9b   : > { %s2558_s9 = smov 128   ;;  %s3154_s12 = smov 8   ;;  %v2116_v38 = vld [vmem:[%s3144_s3 + $0xf] ss:$0 sm:$0xff]  ;;  %v2117_v40 = vld [vmem:[%s3144_s3 + $0x10] ss:$0 sm:$0xff] }
 0xf9c   : > { %2338 = dma.vmem_to_hbm [thread:$0]  (%p2635_p5), %s3064_s20, 512, %s3070_s11, %s3048_s18, %s2558_s9, %s2558_s9, %s3154_s12  }
 0xf9d   : > { %s3155_s17 = sshll.u32 %s2804_s19, 3  ;;  %s3156_s20 = sshll.u32 %s2616_s25, 7 }
 0xf9e   : > { %s246_s26 = scalar_lea.vmem [#allocation3], %s3155_s17  ;;  %s1907_s29 = scalar_lea.hbm %s3145_s4, %s3156_s20 }
 0xf9f   : > { %s1909_s18 = sshll.u32 %s246_s26, 4  ;;  %s1886_s15 = scalar_lea.sflag [#allocation4], %s2804_s19  ;;  %s1910_s18 = int_to_ptr.vmem [resolvable:$true] %s1909_s18 }
 0xfa0   : > { %s2480_s9 = scalar_lea.vmem %s1910_s18, 128  ;;  %s2559_s12 = smov [#allocation3]  }
 0xfa1   : > { %p2481_p1 = scmp.ne.s32.totalorder %s1910_s18, %s2480_s9  ;;  %s2484_s13 = sshll.u32 %s2559_s12, 4  ;;  %s2485_s13 = int_to_ptr.vmem [resolvable:$false] %s2484_s13 }
 0xfa2   : > { %s2486_s14 = scalar_lea.vmem %s2485_s13, 256  ;;  %p2487_p4 = scmp.lt.s32.totalorder %s1910_s18, %s2485_s13 }
 0xfa3   : > { %p2482_p2 = pnand %p2481_p1, %p2635_p5  ;;  %p2488_p7 = scmp.lt.s32.totalorder %s2486_s14, %s2480_s9 }
 0xfa5   : > { %p2483_p3 = pneg %p2482_p2  ;;  %p2489_p8 = por %p2488_p7, %p2487_p4 }
 0xfa7   : > { %p2490_p9 = pnand %p2489_p8, %p2483_p3 }
0x1001   : > { %v1869_v34 = vpop.xlane.xlu1 %1868 }
0x1002   : > { %v1870_v35 = vmul.f32 0.03125, %v1869_v34 }
0x1004   : > { %v1871_v36 = vadd.f32 1e-06, %v1870_v35 }
0x1006   : > { %2426 = vrsqrt.f32 %v1871_v36 }
0x1013   : > { %v2427_v37 = vpop.eup %2426 }
0x1014   : > { %v1873_v39 = vmul.f32 %v2427_v37, %v3035_v31 }
0x1016   : > { %v1878_v41 = vmul.f32 %v2116_v38, %v1873_v39 }
0x1018   : > { %v1883_v42 = vadd.f32 %v2117_v40, %v1878_v41 }
0x101a   : > { %1884 = vst.msk [vmem:[%s246_s26] sm:$0xff] %vm275_vm1, %v1883_v42 }
0x101b   : > { %2493 = shalt.err (!%p2490_p9)
}
0x101c   : > { %s2494_s25 = scalar_lea.hbm %s1907_s29, 128  ;;  %s2498_s10 = scalar_lea.hbm %s3145_s4, 256 }
0x101d   : > { %p2495_p10 = scmp.ne.s32.totalorder %s1907_s29, %s2494_s25  ;;  %p2499_p13 = scmp.lt.s32.totalorder %s1907_s29, %s3145_s4 }
0x101e   : > { %p2500_p0 = scmp.lt.s32.totalorder %s2498_s10, %s2494_s25 }
0x101f   : > { %p2496_p11 = pnand %p2495_p10, %p2635_p5 }
0x1020   : > { %p2501_p1 = por %p2500_p0, %p2499_p13 }
0x1021   : > { %p2497_p12 = pneg %p2496_p11 }
0x1023   : > { %p2502_p2 = pnand %p2501_p1, %p2497_p12 }
0x1025   : > { %2505 = shalt.err (!%p2502_p2)
}
0x1026   : > { %2336 = dma.vmem_to_hbm [thread:$0]  (%p2635_p5), %s1910_s18, 128, %s1907_s29, %s1886_s15  }
0x1027 PF: > { %p2352_p3 = scmp.ge.s32.totalorder %s2544_s24, 2  ;;  %s1950_s20 = sand.u32 1, %s2532_s21  }
0x1028   : > { %s1951_s11 = scalar_lea.sflag [#allocation4], %s1950_s20 }
0x1029   : > { %p2343_p4 = pnand %p2352_p3, %p2639_p6 }
0x102b   : > { %p2344_p7 = pneg %p2343_p4 }
0x102d   : > { %2523 = dma.done.wait (%p2344_p7), %s1951_s11, 128  }
0x102e   : > { %2525 = vsyncadd (%p2344_p7), %s1951_s11, 4294967168  ;;  %s3157_s16 = sadd.s32 4294967294, %s2544_s24  }
0x102f   : > { %s1959_s9 = sand.u32 1, %s3157_s16  }
0x1030   : > { %s1960_s12 = scalar_lea.sflag [#allocation6], %s1959_s9 }
0x1031   : > { %2527 = dma.done.wait (%p2344_p7), %s1960_s12, 640  }
0x1032   : > { %2529 = vsyncadd (%p2344_p7), %s1960_s12, 4294966656  ;;  %p20_p5 = scmp.ge.s32.totalorder %s2620_s27, 4   ;;  %s3158_s21 = smov %s2536_s22 }
0x1033   : > { %s3159_s22 = smov %s2540_s23  ;;  %s3160_s23 = smov %s2633_s30 }
0x1034   : > { %s3161_s24 = smov %s2620_s27  ;;  %22 = sbr.rel (!%p20_p5) target bundleno = 5 (0x5), region = 103 }
0x1039   :  { %1974 = vsyncpa [#allocation4], 1 }
0x103a   :  { %1976 = vsyncpa [#allocation4 + $0x1], 1 }
0x103b   :  { %1977 = vsyncpa [#allocation6], 1 }
0x103c   :  { %1979 = vsyncpa [#allocation6 + $0x1], 1 }

</bundles_post_ra>
